<compile_context>
chip_gen: v6e
topology: v6e:2x2x1
jax: 0.10.0
libtpu: 0.0.40
codegen_flags: <defaults>
</compile_context>

<pallas_src>
import math
import functools

import jax
import jax.numpy as jnp
from jax.experimental import pallas as pl
from jax.experimental.pallas import tpu as pltpu

# ---- model hyper-parameters (small, consistent with the module) ----
WIDTH = 32      # d_model
HEADS = 4       # n_head
LAYERS = 2      # number of MaskResidualAttentionBlocks
SEQ = 8         # L
BATCH = 2       # N
EPS = 1e-5      # LayerNorm eps (PyTorch default)
MASK_SCALE = 0.01
THRESHOLD = 0.005
NEG_INF = -1e30


def _layer_norm(t, w, b):
    # One-pass LayerNorm: var = E[x^2] - mean^2; the two cross-lane reductions are
    # independent so they can overlap on the XLU.
    mu = jnp.mean(t, axis=-1, keepdims=True)
    ms = jnp.mean(t * t, axis=-1, keepdims=True)
    var = ms - mu * mu
    return (t - mu) * jax.lax.rsqrt(var + EPS) * w + b


def _transformer_kernel(x_ref, w_attn_ref, w_fc_ref, w_proj_ref, vecs_ref, o_ref,
                        *, n_head, n_batch):
    """All LAYERS MaskResidualAttentionBlocks fused; x stays in VMEM throughout."""
    n_tokens, d_model = x_ref.shape                      # (R, D), R = L * N (seq-major)
    n_layers = w_fc_ref.shape[0]
    d3 = 3 * d_model
    hd = d_model // n_head

    # Block-diagonal additive bias over the batch, built in-kernel: token t = l*N + n,
    # so two tokens may attend to each other iff t_row % N == t_col % N.
    # TODO(synk): if the module's optional additive attn_mask is ever non-None, fold it in here.
    r_id = jax.lax.broadcasted_iota(jnp.int32, (n_tokens, n_tokens), 0)
    c_id = jax.lax.broadcasted_iota(jnp.int32, (n_tokens, n_tokens), 1)
    attn_bias = jnp.where((r_id % n_batch) == (c_id % n_batch),
                          0.0, NEG_INF).astype(jnp.float32)

    x = x_ref[...].astype(jnp.float32)                   # (R, D)

    for l in range(n_layers):                            # static unroll (LAYERS == 2)
        v_l = vecs_ref[l]                                # (4, 4D) f32 packed vectors
        ln1_w, ln1_b = v_l[0:1, 0:d_model], v_l[0:1, d_model:2 * d_model]
        ln2_w, ln2_b = v_l[0:1, 2 * d_model:3 * d_model], v_l[0:1, 3 * d_model:]
        b_qkv = v_l[1:2, 0:d3]                           # (1, 3D)  q-scale already folded in
        b_o = v_l[1:2, d3:]                              # (1, D)
        b_fc = v_l[2:3, :]                               # (1, 4D)
        b_proj = v_l[3:4, 0:d_model]                     # (1, D)

        w_attn_l = w_attn_ref[l]                         # (D, 4D) bf16: [Wq*scale | Wk | Wv | Wo]
        w_qkv = w_attn_l[:, 0:d3]                        # (D, 3D)
        w_o = w_attn_l[:, d3:]                           # (D, D)

        # ---------------- attention branch (pre-LN) ----------------
        h = _layer_norm(x, ln1_w, ln1_b)
        qkv = jnp.dot(h.astype(jnp.bfloat16), w_qkv,
                      preferred_element_type=jnp.float32) + b_qkv        # (R, 3D) f32

        ctx = []
        for hh in range(n_head):                         # short static head loop
            lo = hh * hd
            q_h = qkv[:, lo:lo + hd].astype(jnp.bfloat16)
            k_h = qkv[:, d_model + lo:d_model + lo + hd].astype(jnp.bfloat16)
            v_h = qkv[:, 2 * d_model + lo:2 * d_model + lo + hd].astype(jnp.bfloat16)
            # scores: contract the head dim of q and k directly (no k.T materialized)
            s = jax.lax.dot_general(q_h, k_h,
                                    dimension_numbers=(((1,), (1,)), ((), ())),
                                    preferred_element_type=jnp.float32)  # (R, R)
            s = s + attn_bias                            # block-diagonal over batch
            s = s - jnp.max(s, axis=-1, keepdims=True)
            p = jnp.exp(s)
            p = p * pl.reciprocal(jnp.sum(p, axis=-1, keepdims=True), approx=True)
            ctx.append(jnp.dot(p.astype(jnp.bfloat16), v_h,
                               preferred_element_type=jnp.float32))      # (R, hd)
        ctx_all = jnp.concatenate(ctx, axis=1)                           # (R, D)
        attn_out = jnp.dot(ctx_all.astype(jnp.bfloat16), w_o,
                           preferred_element_type=jnp.float32) + b_o     # fused out-proj
        x = x + attn_out

        # ---------------- MLP branch (pre-LN) ----------------
        h2 = _layer_norm(x, ln2_w, ln2_b)
        f = jnp.dot(h2.astype(jnp.bfloat16), w_fc_ref[l],
                    preferred_element_type=jnp.float32) + b_fc           # (R, 4D)
        f = f * pl.reciprocal(1.0 + jnp.exp(-1.702 * f), approx=True)    # QuickGELU
        x = x + jnp.dot(f.astype(jnp.bfloat16), w_proj_ref[l],
                        preferred_element_type=jnp.float32) + b_proj

    o_ref[...] = x.astype(o_ref.dtype)


def _forward(x_lnd, packed, n_head):
    """x_lnd: (L, N, D) sequence-first, exactly like the PyTorch module."""
    L, N, D = x_lnd.shape
    x_flat = x_lnd.reshape(L * N, D)                     # free contiguous reshape, no transpose
    w_attn, w_fc, w_proj, vecs = packed
    vmem = pl.BlockSpec(memory_space=pltpu.MemorySpace.VMEM)
    out_flat = pl.pallas_call(
        functools.partial(_transformer_kernel, n_head=n_head, n_batch=N),
        out_shape=jax.ShapeDtypeStruct((L * N, D), x_lnd.dtype),
        in_specs=[vmem] * 5,
        out_specs=vmem,
        input_output_aliases={0: 0},                     # reuse x's buffer for the output
    )(x_flat, w_attn, w_fc, w_proj, vecs)
    return out_flat.reshape(L, N, D)


mask_transformer = jax.jit(_forward, static_argnames=("n_head",))


# ---------------- deterministic parameter setup (host-side glue) ----------------
def _binarize(mask_real, threshold):
    return (mask_real > threshold).astype(jnp.float32)


def init_layer_params(key, width):
    """Raw PyTorch-convention parameters with the ElementWise binarized masks applied."""
    d = width
    ks = jax.random.split(key, 10)

    def w(k, shape, std=0.02):
        return jax.random.normal(k, shape, jnp.float32) * std

    def mask(k, shape):
        m_real = jax.random.uniform(k, shape, jnp.float32, -MASK_SCALE, MASK_SCALE)
        return _binarize(m_real, THRESHOLD)

    return dict(
        in_proj_w=w(ks[0], (3 * d, d)) * mask(ks[1], (3 * d, d)),
        in_proj_b=w(ks[2], (3 * d,)),
        out_proj_w=w(ks[3], (d, d)) * mask(ks[4], (d, d)),
        out_proj_b=jnp.zeros((d,), jnp.float32),
        fc_w=w(ks[5], (4 * d, d)) * mask(ks[6], (4 * d, d)),
        fc_b=w(ks[7], (4 * d,)),
        proj_w=w(ks[8], (d, 4 * d)) * mask(ks[9], (d, 4 * d)),
        proj_b=jnp.zeros((d,), jnp.float32),
        ln1_w=jnp.ones((d,), jnp.float32), ln1_b=jnp.zeros((d,), jnp.float32),
        ln2_w=jnp.ones((d,), jnp.float32), ln2_b=jnp.zeros((d,), jnp.float32),
    )


def pack_params(layer_params, width, n_head):
    """Pack all layers into 4 stacked arrays.

    Weights are pre-transposed to (in, out) and cast to bf16 (MXU operands); the
    1/sqrt(head_dim) query scale is folded into W_q / b_q.  All biases and LayerNorm
    vectors are packed into one (LAYERS, 4, 4D) f32 array:
        row 0: [ln1_w | ln1_b | ln2_w | ln2_b]
        row 1: [b_q*scale | b_k | b_v | b_out_proj]
        row 2: b_fc (width 4D)
        row 3: [b_proj | zeros]
    """
    d = width
    scale = 1.0 / math.sqrt(d // n_head)
    w_attn, w_fc, w_proj, vecs = [], [], [], []
    for p in layer_params:
        wq = p["in_proj_w"][0 * d:1 * d].T * scale       # fold q-scaling into W_q / b_q
        wk = p["in_proj_w"][1 * d:2 * d].T
        wv = p["in_proj_w"][2 * d:3 * d].T
        w_attn.append(jnp.concatenate([wq, wk, wv, p["out_proj_w"].T], axis=1))  # (D, 4D)
        w_fc.append(p["fc_w"].T)                         # (D, 4D)
        w_proj.append(p["proj_w"].T)                     # (4D, D)
        bq = p["in_proj_b"][0 * d:1 * d] * scale
        bk = p["in_proj_b"][1 * d:2 * d]
        bv = p["in_proj_b"][2 * d:3 * d]
        row0 = jnp.concatenate([p["ln1_w"], p["ln1_b"], p["ln2_w"], p["ln2_b"]])
        row1 = jnp.concatenate([bq, bk, bv, p["out_proj_b"]])
        row2 = p["fc_b"]
        row3 = jnp.concatenate([p["proj_b"], jnp.zeros((3 * d,), jnp.float32)])
        vecs.append(jnp.stack([row0, row1, row2, row3], axis=0))                 # (4, 4D)
    return (jnp.stack(w_attn, axis=0).astype(jnp.bfloat16),   # (LAYERS, D, 4D)
            jnp.stack(w_fc, axis=0).astype(jnp.bfloat16),     # (LAYERS, D, 4D)
            jnp.stack(w_proj, axis=0).astype(jnp.bfloat16),   # (LAYERS, 4D, D)
            jnp.stack(vecs, axis=0))                          # (LAYERS, 4, 4D) f32


if __name__ == "__main__":
    key = jax.random.PRNGKey(0)
    kx, kp = jax.random.split(key)

    # x: (L, N, D) sequence-first, matching the PyTorch module's expected layout.
    x = jax.random.normal(kx, (SEQ, BATCH, WIDTH), jnp.float32)

    layer_keys = jax.random.split(kp, LAYERS)
    raw_params = [init_layer_params(k, WIDTH) for k in layer_keys]
    packed = pack_params(raw_params, WIDTH, HEADS)

    out = mask_transformer(x, packed, n_head=HEADS)
    out = jax.block_until_ready(out)
    assert out.shape == (SEQ, BATCH, WIDTH)
    assert jnp.all(jnp.isfinite(out))
    print("KERNEL_OK")
</pallas_src>

<mosaic_0001>
module attributes {stable_mosaic.version = 11 : i64} {
  func.func @_transformer_kernel(%arg0: memref<16x32xf32, #tpu.memory_space<vmem>>, %arg1: memref<2x32x128xbf16, #tpu.memory_space<vmem>>, %arg2: memref<2x32x128xbf16, #tpu.memory_space<vmem>>, %arg3: memref<2x128x32xbf16, #tpu.memory_space<vmem>>, %arg4: memref<2x4x128xf32, #tpu.memory_space<vmem>>, %arg5: memref<16x32xf32, #tpu.memory_space<vmem>>) attributes {dimension_semantics = [], scalar_prefetch = 0 : i64, scratch_operands = 0 : i64, tpu.core_type = #tpu.core_type<tc>} {
    %0 = tpu.iota {dimensions = array<i32: 0>} : vector<16x16xi32>
    %1 = tpu.iota {dimensions = array<i32: 1>} : vector<16x16xi32>
    %c2_i32 = arith.constant 2 : i32
    %c0_i32 = arith.constant 0 : i32
    %2 = arith.cmpi eq, %c2_i32, %c0_i32 : i32
    %c1_i32 = arith.constant 1 : i32
    %3 = arith.select %2, %c1_i32, %c2_i32 : i32
    %4 = vector.broadcast %3 : i32 to vector<16x16xi32>
    %5 = arith.remsi %0, %4 : vector<16x16xi32>
    %c0_i32_0 = arith.constant 0 : i32
    %6 = vector.broadcast %c0_i32_0 : i32 to vector<16x16xi32>
    %7 = arith.cmpi ne, %5, %6 : vector<16x16xi32>
    %c0_i32_1 = arith.constant 0 : i32
    %8 = vector.broadcast %c0_i32_1 : i32 to vector<16x16xi32>
    %9 = arith.cmpi slt, %5, %8 : vector<16x16xi32>
    %c0_i32_2 = arith.constant 0 : i32
    %10 = arith.cmpi slt, %3, %c0_i32_2 : i32
    %11 = vector.broadcast %10 : i1 to vector<16x16xi1>
    %12 = vector.broadcast %11 : vector<16x16xi1> to vector<16x16xi1>
    %13 = arith.xori %9, %12 : vector<16x16xi1>
    %14 = arith.andi %13, %7 : vector<16x16xi1>
    %15 = vector.broadcast %3 : i32 to vector<16x16xi32>
    %16 = arith.addi %5, %15 : vector<16x16xi32>
    %17 = arith.select %14, %16, %5 : vector<16x16xi1>, vector<16x16xi32>
    %c2_i32_3 = arith.constant 2 : i32
    %c0_i32_4 = arith.constant 0 : i32
    %18 = arith.cmpi eq, %c2_i32_3, %c0_i32_4 : i32
    %c1_i32_5 = arith.constant 1 : i32
    %19 = arith.select %18, %c1_i32_5, %c2_i32_3 : i32
    %20 = vector.broadcast %19 : i32 to vector<16x16xi32>
    %21 = arith.remsi %1, %20 : vector<16x16xi32>
    %c0_i32_6 = arith.constant 0 : i32
    %22 = vector.broadcast %c0_i32_6 : i32 to vector<16x16xi32>
    %23 = arith.cmpi ne, %21, %22 : vector<16x16xi32>
    %c0_i32_7 = arith.constant 0 : i32
    %24 = vector.broadcast %c0_i32_7 : i32 to vector<16x16xi32>
    %25 = arith.cmpi slt, %21, %24 : vector<16x16xi32>
    %c0_i32_8 = arith.constant 0 : i32
    %26 = arith.cmpi slt, %19, %c0_i32_8 : i32
    %27 = vector.broadcast %26 : i1 to vector<16x16xi1>
    %28 = vector.broadcast %27 : vector<16x16xi1> to vector<16x16xi1>
    %29 = arith.xori %25, %28 : vector<16x16xi1>
    %30 = arith.andi %29, %23 : vector<16x16xi1>
    %31 = vector.broadcast %19 : i32 to vector<16x16xi32>
    %32 = arith.addi %21, %31 : vector<16x16xi32>
    %33 = arith.select %30, %32, %21 : vector<16x16xi1>, vector<16x16xi32>
    %34 = arith.cmpi eq, %17, %33 : vector<16x16xi32>
    %cst = arith.constant 0.000000e+00 : f32
    %cst_9 = arith.constant -1.000000e+30 : f32
    %35 = vector.broadcast %cst : f32 to vector<16x16xf32>
    %36 = vector.broadcast %cst_9 : f32 to vector<16x16xf32>
    %37 = arith.select %34, %35, %36 : vector<16x16xi1>, vector<16x16xf32>
    %c0 = arith.constant 0 : index
    %c0_10 = arith.constant 0 : index
    %38 = vector.load %arg0[%c0, %c0_10] : memref<16x32xf32, #tpu.memory_space<vmem>>, vector<16x32xf32>
    %c0_11 = arith.constant 0 : index
    %c0_12 = arith.constant 0 : index
    %c0_13 = arith.constant 0 : index
    %39 = vector.load %arg4[%c0_11, %c0_12, %c0_13] : memref<2x4x128xf32, #tpu.memory_space<vmem>>, vector<1x4x128xf32>
    %40 = vector.shape_cast %39 : vector<1x4x128xf32> to vector<4x128xf32>
    %41 = vector.extract_strided_slice %40 {offsets = [0, 0], sizes = [1, 32], strides = [1, 1]} : vector<4x128xf32> to vector<1x32xf32>
    %42 = vector.extract_strided_slice %40 {offsets = [0, 32], sizes = [1, 32], strides = [1, 1]} : vector<4x128xf32> to vector<1x32xf32>
    %43 = vector.extract_strided_slice %40 {offsets = [0, 64], sizes = [1, 32], strides = [1, 1]} : vector<4x128xf32> to vector<1x32xf32>
    %44 = vector.extract_strided_slice %40 {offsets = [0, 96], sizes = [1, 32], strides = [1, 1]} : vector<4x128xf32> to vector<1x32xf32>
    %45 = vector.extract_strided_slice %40 {offsets = [1, 0], sizes = [1, 96], strides = [1, 1]} : vector<4x128xf32> to vector<1x96xf32>
    %46 = vector.extract_strided_slice %40 {offsets = [1, 96], sizes = [1, 32], strides = [1, 1]} : vector<4x128xf32> to vector<1x32xf32>
    %47 = vector.extract_strided_slice %40 {offsets = [2, 0], sizes = [1, 128], strides = [1, 1]} : vector<4x128xf32> to vector<1x128xf32>
    %48 = vector.extract_strided_slice %40 {offsets = [3, 0], sizes = [1, 32], strides = [1, 1]} : vector<4x128xf32> to vector<1x32xf32>
    %c0_14 = arith.constant 0 : index
    %c0_15 = arith.constant 0 : index
    %c0_16 = arith.constant 0 : index
    %49 = vector.load %arg1[%c0_14, %c0_15, %c0_16] : memref<2x32x128xbf16, #tpu.memory_space<vmem>>, vector<1x32x128xbf16>
    %50 = vector.shape_cast %49 : vector<1x32x128xbf16> to vector<32x128xbf16>
    %51 = vector.extract_strided_slice %50 {offsets = [0, 0], sizes = [32, 96], strides = [1, 1]} : vector<32x128xbf16> to vector<32x96xbf16>
    %52 = vector.extract_strided_slice %50 {offsets = [0, 96], sizes = [32, 32], strides = [1, 1]} : vector<32x128xbf16> to vector<32x32xbf16>
    %cst_17 = arith.constant dense<0.000000e+00> : vector<16xf32>
    %53 = vector.multi_reduction <add>, %38, %cst_17 [1] : vector<16x32xf32> to vector<16xf32>
    %54 = vector.shape_cast %53 : vector<16xf32> to vector<16x1xf32>
    %cst_18 = arith.constant 3.200000e+01 : f32
    %55 = vector.broadcast %cst_18 : f32 to vector<16x1xf32>
    %56 = arith.divf %54, %55 : vector<16x1xf32>
    %57 = arith.mulf %38, %38 : vector<16x32xf32>
    %cst_19 = arith.constant dense<0.000000e+00> : vector<16xf32>
    %58 = vector.multi_reduction <add>, %57, %cst_19 [1] : vector<16x32xf32> to vector<16xf32>
    %59 = vector.shape_cast %58 : vector<16xf32> to vector<16x1xf32>
    %cst_20 = arith.constant 3.200000e+01 : f32
    %60 = vector.broadcast %cst_20 : f32 to vector<16x1xf32>
    %61 = arith.divf %59, %60 : vector<16x1xf32>
    %62 = arith.mulf %56, %56 : vector<16x1xf32>
    %63 = arith.subf %61, %62 : vector<16x1xf32>
    %64 = vector.broadcast %56 : vector<16x1xf32> to vector<16x32xf32>
    %65 = arith.subf %38, %64 : vector<16x32xf32>
    %cst_21 = arith.constant 9.99999974E-6 : f32
    %66 = vector.broadcast %cst_21 : f32 to vector<16x1xf32>
    %67 = arith.addf %63, %66 : vector<16x1xf32>
    %68 = math.rsqrt %67 : vector<16x1xf32>
    %69 = vector.broadcast %68 : vector<16x1xf32> to vector<16x32xf32>
    %70 = arith.mulf %65, %69 : vector<16x32xf32>
    %71 = vector.broadcast %41 : vector<1x32xf32> to vector<16x32xf32>
    %72 = arith.mulf %70, %71 : vector<16x32xf32>
    %73 = vector.broadcast %42 : vector<1x32xf32> to vector<16x32xf32>
    %74 = arith.addf %72, %73 : vector<16x32xf32>
    %75 = arith.truncf %74 : vector<16x32xf32> to vector<16x32xbf16>
    %cst_22 = arith.constant dense<0.000000e+00> : vector<16x96xf32>
    %76 = tpu.matmul %75, %51, %cst_22 {dimension_numbers = #tpu.dot_dimension_numbers<[1], [0], [0], [1], [0, 0, 1, 1], [], []>} : vector<16x32xbf16>, vector<32x96xbf16>, vector<16x96xf32> -> vector<16x96xf32>
    %77 = vector.broadcast %45 : vector<1x96xf32> to vector<16x96xf32>
    %78 = arith.addf %76, %77 : vector<16x96xf32>
    %79 = vector.extract_strided_slice %78 {offsets = [0, 0], sizes = [16, 8], strides = [1, 1]} : vector<16x96xf32> to vector<16x8xf32>
    %80 = arith.truncf %79 : vector<16x8xf32> to vector<16x8xbf16>
    %81 = vector.extract_strided_slice %78 {offsets = [0, 32], sizes = [16, 8], strides = [1, 1]} : vector<16x96xf32> to vector<16x8xf32>
    %82 = arith.truncf %81 : vector<16x8xf32> to vector<16x8xbf16>
    %83 = vector.extract_strided_slice %78 {offsets = [0, 64], sizes = [16, 8], strides = [1, 1]} : vector<16x96xf32> to vector<16x8xf32>
    %84 = arith.truncf %83 : vector<16x8xf32> to vector<16x8xbf16>
    %cst_23 = arith.constant dense<0.000000e+00> : vector<16x16xf32>
    %85 = tpu.matmul %80, %82, %cst_23 {dimension_numbers = #tpu.dot_dimension_numbers<[1], [1], [0], [0], [0, 0, 1, 0], [], []>} : vector<16x8xbf16>, vector<16x8xbf16>, vector<16x16xf32> -> vector<16x16xf32>
    %86 = arith.addf %85, %37 : vector<16x16xf32>
    %cst_24 = arith.constant dense<0xFF800000> : vector<16xf32>
    %87 = vector.multi_reduction <maximumf>, %86, %cst_24 [1] : vector<16x16xf32> to vector<16xf32>
    %88 = vector.shape_cast %87 : vector<16xf32> to vector<16x1xf32>
    %89 = vector.broadcast %88 : vector<16x1xf32> to vector<16x16xf32>
    %90 = arith.subf %86, %89 : vector<16x16xf32>
    %91 = math.exp %90 : vector<16x16xf32>
    %cst_25 = arith.constant dense<0.000000e+00> : vector<16xf32>
    %92 = vector.multi_reduction <add>, %91, %cst_25 [1] : vector<16x16xf32> to vector<16xf32>
    %93 = vector.shape_cast %92 : vector<16xf32> to vector<16x1xf32>
    %94 = tpu.reciprocal %93 {approx = true} : vector<16x1xf32> -> vector<16x1xf32>
    %95 = vector.broadcast %94 : vector<16x1xf32> to vector<16x16xf32>
    %96 = arith.mulf %91, %95 : vector<16x16xf32>
    %97 = arith.truncf %96 : vector<16x16xf32> to vector<16x16xbf16>
    %cst_26 = arith.constant dense<0.000000e+00> : vector<16x8xf32>
    %98 = tpu.matmul %97, %84, %cst_26 {dimension_numbers = #tpu.dot_dimension_numbers<[1], [0], [0], [1], [0, 0, 1, 1], [], []>} : vector<16x16xbf16>, vector<16x8xbf16>, vector<16x8xf32> -> vector<16x8xf32>
    %99 = vector.extract_strided_slice %78 {offsets = [0, 8], sizes = [16, 8], strides = [1, 1]} : vector<16x96xf32> to vector<16x8xf32>
    %100 = arith.truncf %99 : vector<16x8xf32> to vector<16x8xbf16>
    %101 = vector.extract_strided_slice %78 {offsets = [0, 40], sizes = [16, 8], strides = [1, 1]} : vector<16x96xf32> to vector<16x8xf32>
    %102 = arith.truncf %101 : vector<16x8xf32> to vector<16x8xbf16>
    %103 = vector.extract_strided_slice %78 {offsets = [0, 72], sizes = [16, 8], strides = [1, 1]} : vector<16x96xf32> to vector<16x8xf32>
    %104 = arith.truncf %103 : vector<16x8xf32> to vector<16x8xbf16>
    %cst_27 = arith.constant dense<0.000000e+00> : vector<16x16xf32>
    %105 = tpu.matmul %100, %102, %cst_27 {dimension_numbers = #tpu.dot_dimension_numbers<[1], [1], [0], [0], [0, 0, 1, 0], [], []>} : vector<16x8xbf16>, vector<16x8xbf16>, vector<16x16xf32> -> vector<16x16xf32>
    %106 = arith.addf %105, %37 : vector<16x16xf32>
    %cst_28 = arith.constant dense<0xFF800000> : vector<16xf32>
    %107 = vector.multi_reduction <maximumf>, %106, %cst_28 [1] : vector<16x16xf32> to vector<16xf32>
    %108 = vector.shape_cast %107 : vector<16xf32> to vector<16x1xf32>
    %109 = vector.broadcast %108 : vector<16x1xf32> to vector<16x16xf32>
    %110 = arith.subf %106, %109 : vector<16x16xf32>
    %111 = math.exp %110 : vector<16x16xf32>
    %cst_29 = arith.constant dense<0.000000e+00> : vector<16xf32>
    %112 = vector.multi_reduction <add>, %111, %cst_29 [1] : vector<16x16xf32> to vector<16xf32>
    %113 = vector.shape_cast %112 : vector<16xf32> to vector<16x1xf32>
    %114 = tpu.reciprocal %113 {approx = true} : vector<16x1xf32> -> vector<16x1xf32>
    %115 = vector.broadcast %114 : vector<16x1xf32> to vector<16x16xf32>
    %116 = arith.mulf %111, %115 : vector<16x16xf32>
    %117 = arith.truncf %116 : vector<16x16xf32> to vector<16x16xbf16>
    %cst_30 = arith.constant dense<0.000000e+00> : vector<16x8xf32>
    %118 = tpu.matmul %117, %104, %cst_30 {dimension_numbers = #tpu.dot_dimension_numbers<[1], [0], [0], [1], [0, 0, 1, 1], [], []>} : vector<16x16xbf16>, vector<16x8xbf16>, vector<16x8xf32> -> vector<16x8xf32>
    %119 = vector.extract_strided_slice %78 {offsets = [0, 16], sizes = [16, 8], strides = [1, 1]} : vector<16x96xf32> to vector<16x8xf32>
    %120 = arith.truncf %119 : vector<16x8xf32> to vector<16x8xbf16>
    %121 = vector.extract_strided_slice %78 {offsets = [0, 48], sizes = [16, 8], strides = [1, 1]} : vector<16x96xf32> to vector<16x8xf32>
    %122 = arith.truncf %121 : vector<16x8xf32> to vector<16x8xbf16>
    %123 = vector.extract_strided_slice %78 {offsets = [0, 80], sizes = [16, 8], strides = [1, 1]} : vector<16x96xf32> to vector<16x8xf32>
    %124 = arith.truncf %123 : vector<16x8xf32> to vector<16x8xbf16>
    %cst_31 = arith.constant dense<0.000000e+00> : vector<16x16xf32>
    %125 = tpu.matmul %120, %122, %cst_31 {dimension_numbers = #tpu.dot_dimension_numbers<[1], [1], [0], [0], [0, 0, 1, 0], [], []>} : vector<16x8xbf16>, vector<16x8xbf16>, vector<16x16xf32> -> vector<16x16xf32>
    %126 = arith.addf %125, %37 : vector<16x16xf32>
    %cst_32 = arith.constant dense<0xFF800000> : vector<16xf32>
    %127 = vector.multi_reduction <maximumf>, %126, %cst_32 [1] : vector<16x16xf32> to vector<16xf32>
    %128 = vector.shape_cast %127 : vector<16xf32> to vector<16x1xf32>
    %129 = vector.broadcast %128 : vector<16x1xf32> to vector<16x16xf32>
    %130 = arith.subf %126, %129 : vector<16x16xf32>
    %131 = math.exp %130 : vector<16x16xf32>
    %cst_33 = arith.constant dense<0.000000e+00> : vector<16xf32>
    %132 = vector.multi_reduction <add>, %131, %cst_33 [1] : vector<16x16xf32> to vector<16xf32>
    %133 = vector.shape_cast %132 : vector<16xf32> to vector<16x1xf32>
    %134 = tpu.reciprocal %133 {approx = true} : vector<16x1xf32> -> vector<16x1xf32>
    %135 = vector.broadcast %134 : vector<16x1xf32> to vector<16x16xf32>
    %136 = arith.mulf %131, %135 : vector<16x16xf32>
    %137 = arith.truncf %136 : vector<16x16xf32> to vector<16x16xbf16>
    %cst_34 = arith.constant dense<0.000000e+00> : vector<16x8xf32>
    %138 = tpu.matmul %137, %124, %cst_34 {dimension_numbers = #tpu.dot_dimension_numbers<[1], [0], [0], [1], [0, 0, 1, 1], [], []>} : vector<16x16xbf16>, vector<16x8xbf16>, vector<16x8xf32> -> vector<16x8xf32>
    %139 = vector.extract_strided_slice %78 {offsets = [0, 24], sizes = [16, 8], strides = [1, 1]} : vector<16x96xf32> to vector<16x8xf32>
    %140 = arith.truncf %139 : vector<16x8xf32> to vector<16x8xbf16>
    %141 = vector.extract_strided_slice %78 {offsets = [0, 56], sizes = [16, 8], strides = [1, 1]} : vector<16x96xf32> to vector<16x8xf32>
    %142 = arith.truncf %141 : vector<16x8xf32> to vector<16x8xbf16>
    %143 = vector.extract_strided_slice %78 {offsets = [0, 88], sizes = [16, 8], strides = [1, 1]} : vector<16x96xf32> to vector<16x8xf32>
    %144 = arith.truncf %143 : vector<16x8xf32> to vector<16x8xbf16>
    %cst_35 = arith.constant dense<0.000000e+00> : vector<16x16xf32>
    %145 = tpu.matmul %140, %142, %cst_35 {dimension_numbers = #tpu.dot_dimension_numbers<[1], [1], [0], [0], [0, 0, 1, 0], [], []>} : vector<16x8xbf16>, vector<16x8xbf16>, vector<16x16xf32> -> vector<16x16xf32>
    %146 = arith.addf %145, %37 : vector<16x16xf32>
    %cst_36 = arith.constant dense<0xFF800000> : vector<16xf32>
    %147 = vector.multi_reduction <maximumf>, %146, %cst_36 [1] : vector<16x16xf32> to vector<16xf32>
    %148 = vector.shape_cast %147 : vector<16xf32> to vector<16x1xf32>
    %149 = vector.broadcast %148 : vector<16x1xf32> to vector<16x16xf32>
    %150 = arith.subf %146, %149 : vector<16x16xf32>
    %151 = math.exp %150 : vector<16x16xf32>
    %cst_37 = arith.constant dense<0.000000e+00> : vector<16xf32>
    %152 = vector.multi_reduction <add>, %151, %cst_37 [1] : vector<16x16xf32> to vector<16xf32>
    %153 = vector.shape_cast %152 : vector<16xf32> to vector<16x1xf32>
    %154 = tpu.reciprocal %153 {approx = true} : vector<16x1xf32> -> vector<16x1xf32>
    %155 = vector.broadcast %154 : vector<16x1xf32> to vector<16x16xf32>
    %156 = arith.mulf %151, %155 : vector<16x16xf32>
    %157 = arith.truncf %156 : vector<16x16xf32> to vector<16x16xbf16>
    %cst_38 = arith.constant dense<0.000000e+00> : vector<16x8xf32>
    %158 = tpu.matmul %157, %144, %cst_38 {dimension_numbers = #tpu.dot_dimension_numbers<[1], [0], [0], [1], [0, 0, 1, 1], [], []>} : vector<16x16xbf16>, vector<16x8xbf16>, vector<16x8xf32> -> vector<16x8xf32>
    %159 = tpu.concatenate %98, %118, %138, %158 in 1 : vector<16x8xf32>, vector<16x8xf32>, vector<16x8xf32>, vector<16x8xf32> -> vector<16x32xf32>
    %160 = arith.truncf %159 : vector<16x32xf32> to vector<16x32xbf16>
    %cst_39 = arith.constant dense<0.000000e+00> : vector<16x32xf32>
    %161 = tpu.matmul %160, %52, %cst_39 {dimension_numbers = #tpu.dot_dimension_numbers<[1], [0], [0], [1], [0, 0, 1, 1], [], []>} : vector<16x32xbf16>, vector<32x32xbf16>, vector<16x32xf32> -> vector<16x32xf32>
    %162 = vector.broadcast %46 : vector<1x32xf32> to vector<16x32xf32>
    %163 = arith.addf %161, %162 : vector<16x32xf32>
    %164 = arith.addf %38, %163 : vector<16x32xf32>
    %cst_40 = arith.constant dense<0.000000e+00> : vector<16xf32>
    %165 = vector.multi_reduction <add>, %164, %cst_40 [1] : vector<16x32xf32> to vector<16xf32>
    %166 = vector.shape_cast %165 : vector<16xf32> to vector<16x1xf32>
    %cst_41 = arith.constant 3.200000e+01 : f32
    %167 = vector.broadcast %cst_41 : f32 to vector<16x1xf32>
    %168 = arith.divf %166, %167 : vector<16x1xf32>
    %169 = arith.mulf %164, %164 : vector<16x32xf32>
    %cst_42 = arith.constant dense<0.000000e+00> : vector<16xf32>
    %170 = vector.multi_reduction <add>, %169, %cst_42 [1] : vector<16x32xf32> to vector<16xf32>
    %171 = vector.shape_cast %170 : vector<16xf32> to vector<16x1xf32>
    %cst_43 = arith.constant 3.200000e+01 : f32
    %172 = vector.broadcast %cst_43 : f32 to vector<16x1xf32>
    %173 = arith.divf %171, %172 : vector<16x1xf32>
    %174 = arith.mulf %168, %168 : vector<16x1xf32>
    %175 = arith.subf %173, %174 : vector<16x1xf32>
    %176 = vector.broadcast %168 : vector<16x1xf32> to vector<16x32xf32>
    %177 = arith.subf %164, %176 : vector<16x32xf32>
    %cst_44 = arith.constant 9.99999974E-6 : f32
    %178 = vector.broadcast %cst_44 : f32 to vector<16x1xf32>
    %179 = arith.addf %175, %178 : vector<16x1xf32>
    %180 = math.rsqrt %179 : vector<16x1xf32>
    %181 = vector.broadcast %180 : vector<16x1xf32> to vector<16x32xf32>
    %182 = arith.mulf %177, %181 : vector<16x32xf32>
    %183 = vector.broadcast %43 : vector<1x32xf32> to vector<16x32xf32>
    %184 = arith.mulf %182, %183 : vector<16x32xf32>
    %185 = vector.broadcast %44 : vector<1x32xf32> to vector<16x32xf32>
    %186 = arith.addf %184, %185 : vector<16x32xf32>
    %187 = arith.truncf %186 : vector<16x32xf32> to vector<16x32xbf16>
    %c0_45 = arith.constant 0 : index
    %c0_46 = arith.constant 0 : index
    %c0_47 = arith.constant 0 : index
    %188 = vector.load %arg2[%c0_45, %c0_46, %c0_47] : memref<2x32x128xbf16, #tpu.memory_space<vmem>>, vector<1x32x128xbf16>
    %189 = vector.shape_cast %188 : vector<1x32x128xbf16> to vector<32x128xbf16>
    %cst_48 = arith.constant dense<0.000000e+00> : vector<16x128xf32>
    %190 = tpu.matmul %187, %189, %cst_48 {dimension_numbers = #tpu.dot_dimension_numbers<[1], [0], [0], [1], [0, 0, 1, 1], [], []>} : vector<16x32xbf16>, vector<32x128xbf16>, vector<16x128xf32> -> vector<16x128xf32>
    %191 = vector.broadcast %47 : vector<1x128xf32> to vector<16x128xf32>
    %192 = arith.addf %190, %191 : vector<16x128xf32>
    %cst_49 = arith.constant -1.702000e+00 : f32
    %193 = vector.broadcast %cst_49 : f32 to vector<16x128xf32>
    %194 = arith.mulf %193, %192 : vector<16x128xf32>
    %195 = math.exp %194 : vector<16x128xf32>
    %cst_50 = arith.constant 1.000000e+00 : f32
    %196 = vector.broadcast %cst_50 : f32 to vector<16x128xf32>
    %197 = arith.addf %196, %195 : vector<16x128xf32>
    %198 = tpu.reciprocal %197 {approx = true} : vector<16x128xf32> -> vector<16x128xf32>
    %199 = arith.mulf %192, %198 : vector<16x128xf32>
    %200 = arith.truncf %199 : vector<16x128xf32> to vector<16x128xbf16>
    %c0_51 = arith.constant 0 : index
    %c0_52 = arith.constant 0 : index
    %c0_53 = arith.constant 0 : index
    %201 = vector.load %arg3[%c0_51, %c0_52, %c0_53] : memref<2x128x32xbf16, #tpu.memory_space<vmem>>, vector<1x128x32xbf16>
    %202 = vector.shape_cast %201 : vector<1x128x32xbf16> to vector<128x32xbf16>
    %cst_54 = arith.constant dense<0.000000e+00> : vector<16x32xf32>
    %203 = tpu.matmul %200, %202, %cst_54 {dimension_numbers = #tpu.dot_dimension_numbers<[1], [0], [0], [1], [0, 0, 1, 1], [], []>} : vector<16x128xbf16>, vector<128x32xbf16>, vector<16x32xf32> -> vector<16x32xf32>
    %204 = arith.addf %164, %203 : vector<16x32xf32>
    %205 = vector.broadcast %48 : vector<1x32xf32> to vector<16x32xf32>
    %206 = arith.addf %204, %205 : vector<16x32xf32>
    %c1 = arith.constant 1 : index
    %c0_55 = arith.constant 0 : index
    %c0_56 = arith.constant 0 : index
    %207 = vector.load %arg4[%c1, %c0_55, %c0_56] : memref<2x4x128xf32, #tpu.memory_space<vmem>>, vector<1x4x128xf32>
    %208 = vector.shape_cast %207 : vector<1x4x128xf32> to vector<4x128xf32>
    %209 = vector.extract_strided_slice %208 {offsets = [0, 0], sizes = [1, 32], strides = [1, 1]} : vector<4x128xf32> to vector<1x32xf32>
    %210 = vector.extract_strided_slice %208 {offsets = [0, 32], sizes = [1, 32], strides = [1, 1]} : vector<4x128xf32> to vector<1x32xf32>
    %211 = vector.extract_strided_slice %208 {offsets = [0, 64], sizes = [1, 32], strides = [1, 1]} : vector<4x128xf32> to vector<1x32xf32>
    %212 = vector.extract_strided_slice %208 {offsets = [0, 96], sizes = [1, 32], strides = [1, 1]} : vector<4x128xf32> to vector<1x32xf32>
    %213 = vector.extract_strided_slice %208 {offsets = [1, 0], sizes = [1, 96], strides = [1, 1]} : vector<4x128xf32> to vector<1x96xf32>
    %214 = vector.extract_strided_slice %208 {offsets = [1, 96], sizes = [1, 32], strides = [1, 1]} : vector<4x128xf32> to vector<1x32xf32>
    %215 = vector.extract_strided_slice %208 {offsets = [2, 0], sizes = [1, 128], strides = [1, 1]} : vector<4x128xf32> to vector<1x128xf32>
    %216 = vector.extract_strided_slice %208 {offsets = [3, 0], sizes = [1, 32], strides = [1, 1]} : vector<4x128xf32> to vector<1x32xf32>
    %c1_57 = arith.constant 1 : index
    %c0_58 = arith.constant 0 : index
    %c0_59 = arith.constant 0 : index
    %217 = vector.load %arg1[%c1_57, %c0_58, %c0_59] : memref<2x32x128xbf16, #tpu.memory_space<vmem>>, vector<1x32x128xbf16>
    %218 = vector.shape_cast %217 : vector<1x32x128xbf16> to vector<32x128xbf16>
    %219 = vector.extract_strided_slice %218 {offsets = [0, 0], sizes = [32, 96], strides = [1, 1]} : vector<32x128xbf16> to vector<32x96xbf16>
    %220 = vector.extract_strided_slice %218 {offsets = [0, 96], sizes = [32, 32], strides = [1, 1]} : vector<32x128xbf16> to vector<32x32xbf16>
    %cst_60 = arith.constant dense<0.000000e+00> : vector<16xf32>
    %221 = vector.multi_reduction <add>, %206, %cst_60 [1] : vector<16x32xf32> to vector<16xf32>
    %222 = vector.shape_cast %221 : vector<16xf32> to vector<16x1xf32>
    %cst_61 = arith.constant 3.200000e+01 : f32
    %223 = vector.broadcast %cst_61 : f32 to vector<16x1xf32>
    %224 = arith.divf %222, %223 : vector<16x1xf32>
    %225 = arith.mulf %206, %206 : vector<16x32xf32>
    %cst_62 = arith.constant dense<0.000000e+00> : vector<16xf32>
    %226 = vector.multi_reduction <add>, %225, %cst_62 [1] : vector<16x32xf32> to vector<16xf32>
    %227 = vector.shape_cast %226 : vector<16xf32> to vector<16x1xf32>
    %cst_63 = arith.constant 3.200000e+01 : f32
    %228 = vector.broadcast %cst_63 : f32 to vector<16x1xf32>
    %229 = arith.divf %227, %228 : vector<16x1xf32>
    %230 = arith.mulf %224, %224 : vector<16x1xf32>
    %231 = arith.subf %229, %230 : vector<16x1xf32>
    %232 = vector.broadcast %224 : vector<16x1xf32> to vector<16x32xf32>
    %233 = arith.subf %206, %232 : vector<16x32xf32>
    %cst_64 = arith.constant 9.99999974E-6 : f32
    %234 = vector.broadcast %cst_64 : f32 to vector<16x1xf32>
    %235 = arith.addf %231, %234 : vector<16x1xf32>
    %236 = math.rsqrt %235 : vector<16x1xf32>
    %237 = vector.broadcast %236 : vector<16x1xf32> to vector<16x32xf32>
    %238 = arith.mulf %233, %237 : vector<16x32xf32>
    %239 = vector.broadcast %209 : vector<1x32xf32> to vector<16x32xf32>
    %240 = arith.mulf %238, %239 : vector<16x32xf32>
    %241 = vector.broadcast %210 : vector<1x32xf32> to vector<16x32xf32>
    %242 = arith.addf %240, %241 : vector<16x32xf32>
    %243 = arith.truncf %242 : vector<16x32xf32> to vector<16x32xbf16>
    %cst_65 = arith.constant dense<0.000000e+00> : vector<16x96xf32>
    %244 = tpu.matmul %243, %219, %cst_65 {dimension_numbers = #tpu.dot_dimension_numbers<[1], [0], [0], [1], [0, 0, 1, 1], [], []>} : vector<16x32xbf16>, vector<32x96xbf16>, vector<16x96xf32> -> vector<16x96xf32>
    %245 = vector.broadcast %213 : vector<1x96xf32> to vector<16x96xf32>
    %246 = arith.addf %244, %245 : vector<16x96xf32>
    %247 = vector.extract_strided_slice %246 {offsets = [0, 0], sizes = [16, 8], strides = [1, 1]} : vector<16x96xf32> to vector<16x8xf32>
    %248 = arith.truncf %247 : vector<16x8xf32> to vector<16x8xbf16>
    %249 = vector.extract_strided_slice %246 {offsets = [0, 32], sizes = [16, 8], strides = [1, 1]} : vector<16x96xf32> to vector<16x8xf32>
    %250 = arith.truncf %249 : vector<16x8xf32> to vector<16x8xbf16>
    %251 = vector.extract_strided_slice %246 {offsets = [0, 64], sizes = [16, 8], strides = [1, 1]} : vector<16x96xf32> to vector<16x8xf32>
    %252 = arith.truncf %251 : vector<16x8xf32> to vector<16x8xbf16>
    %cst_66 = arith.constant dense<0.000000e+00> : vector<16x16xf32>
    %253 = tpu.matmul %248, %250, %cst_66 {dimension_numbers = #tpu.dot_dimension_numbers<[1], [1], [0], [0], [0, 0, 1, 0], [], []>} : vector<16x8xbf16>, vector<16x8xbf16>, vector<16x16xf32> -> vector<16x16xf32>
    %254 = arith.addf %253, %37 : vector<16x16xf32>
    %cst_67 = arith.constant dense<0xFF800000> : vector<16xf32>
    %255 = vector.multi_reduction <maximumf>, %254, %cst_67 [1] : vector<16x16xf32> to vector<16xf32>
    %256 = vector.shape_cast %255 : vector<16xf32> to vector<16x1xf32>
    %257 = vector.broadcast %256 : vector<16x1xf32> to vector<16x16xf32>
    %258 = arith.subf %254, %257 : vector<16x16xf32>
    %259 = math.exp %258 : vector<16x16xf32>
    %cst_68 = arith.constant dense<0.000000e+00> : vector<16xf32>
    %260 = vector.multi_reduction <add>, %259, %cst_68 [1] : vector<16x16xf32> to vector<16xf32>
    %261 = vector.shape_cast %260 : vector<16xf32> to vector<16x1xf32>
    %262 = tpu.reciprocal %261 {approx = true} : vector<16x1xf32> -> vector<16x1xf32>
    %263 = vector.broadcast %262 : vector<16x1xf32> to vector<16x16xf32>
    %264 = arith.mulf %259, %263 : vector<16x16xf32>
    %265 = arith.truncf %264 : vector<16x16xf32> to vector<16x16xbf16>
    %cst_69 = arith.constant dense<0.000000e+00> : vector<16x8xf32>
    %266 = tpu.matmul %265, %252, %cst_69 {dimension_numbers = #tpu.dot_dimension_numbers<[1], [0], [0], [1], [0, 0, 1, 1], [], []>} : vector<16x16xbf16>, vector<16x8xbf16>, vector<16x8xf32> -> vector<16x8xf32>
    %267 = vector.extract_strided_slice %246 {offsets = [0, 8], sizes = [16, 8], strides = [1, 1]} : vector<16x96xf32> to vector<16x8xf32>
    %268 = arith.truncf %267 : vector<16x8xf32> to vector<16x8xbf16>
    %269 = vector.extract_strided_slice %246 {offsets = [0, 40], sizes = [16, 8], strides = [1, 1]} : vector<16x96xf32> to vector<16x8xf32>
    %270 = arith.truncf %269 : vector<16x8xf32> to vector<16x8xbf16>
    %271 = vector.extract_strided_slice %246 {offsets = [0, 72], sizes = [16, 8], strides = [1, 1]} : vector<16x96xf32> to vector<16x8xf32>
    %272 = arith.truncf %271 : vector<16x8xf32> to vector<16x8xbf16>
    %cst_70 = arith.constant dense<0.000000e+00> : vector<16x16xf32>
    %273 = tpu.matmul %268, %270, %cst_70 {dimension_numbers = #tpu.dot_dimension_numbers<[1], [1], [0], [0], [0, 0, 1, 0], [], []>} : vector<16x8xbf16>, vector<16x8xbf16>, vector<16x16xf32> -> vector<16x16xf32>
    %274 = arith.addf %273, %37 : vector<16x16xf32>
    %cst_71 = arith.constant dense<0xFF800000> : vector<16xf32>
    %275 = vector.multi_reduction <maximumf>, %274, %cst_71 [1] : vector<16x16xf32> to vector<16xf32>
    %276 = vector.shape_cast %275 : vector<16xf32> to vector<16x1xf32>
    %277 = vector.broadcast %276 : vector<16x1xf32> to vector<16x16xf32>
    %278 = arith.subf %274, %277 : vector<16x16xf32>
    %279 = math.exp %278 : vector<16x16xf32>
    %cst_72 = arith.constant dense<0.000000e+00> : vector<16xf32>
    %280 = vector.multi_reduction <add>, %279, %cst_72 [1] : vector<16x16xf32> to vector<16xf32>
    %281 = vector.shape_cast %280 : vector<16xf32> to vector<16x1xf32>
    %282 = tpu.reciprocal %281 {approx = true} : vector<16x1xf32> -> vector<16x1xf32>
    %283 = vector.broadcast %282 : vector<16x1xf32> to vector<16x16xf32>
    %284 = arith.mulf %279, %283 : vector<16x16xf32>
    %285 = arith.truncf %284 : vector<16x16xf32> to vector<16x16xbf16>
    %cst_73 = arith.constant dense<0.000000e+00> : vector<16x8xf32>
    %286 = tpu.matmul %285, %272, %cst_73 {dimension_numbers = #tpu.dot_dimension_numbers<[1], [0], [0], [1], [0, 0, 1, 1], [], []>} : vector<16x16xbf16>, vector<16x8xbf16>, vector<16x8xf32> -> vector<16x8xf32>
    %287 = vector.extract_strided_slice %246 {offsets = [0, 16], sizes = [16, 8], strides = [1, 1]} : vector<16x96xf32> to vector<16x8xf32>
    %288 = arith.truncf %287 : vector<16x8xf32> to vector<16x8xbf16>
    %289 = vector.extract_strided_slice %246 {offsets = [0, 48], sizes = [16, 8], strides = [1, 1]} : vector<16x96xf32> to vector<16x8xf32>
    %290 = arith.truncf %289 : vector<16x8xf32> to vector<16x8xbf16>
    %291 = vector.extract_strided_slice %246 {offsets = [0, 80], sizes = [16, 8], strides = [1, 1]} : vector<16x96xf32> to vector<16x8xf32>
    %292 = arith.truncf %291 : vector<16x8xf32> to vector<16x8xbf16>
    %cst_74 = arith.constant dense<0.000000e+00> : vector<16x16xf32>
    %293 = tpu.matmul %288, %290, %cst_74 {dimension_numbers = #tpu.dot_dimension_numbers<[1], [1], [0], [0], [0, 0, 1, 0], [], []>} : vector<16x8xbf16>, vector<16x8xbf16>, vector<16x16xf32> -> vector<16x16xf32>
    %294 = arith.addf %293, %37 : vector<16x16xf32>
    %cst_75 = arith.constant dense<0xFF800000> : vector<16xf32>
    %295 = vector.multi_reduction <maximumf>, %294, %cst_75 [1] : vector<16x16xf32> to vector<16xf32>
    %296 = vector.shape_cast %295 : vector<16xf32> to vector<16x1xf32>
    %297 = vector.broadcast %296 : vector<16x1xf32> to vector<16x16xf32>
    %298 = arith.subf %294, %297 : vector<16x16xf32>
    %299 = math.exp %298 : vector<16x16xf32>
    %cst_76 = arith.constant dense<0.000000e+00> : vector<16xf32>
    %300 = vector.multi_reduction <add>, %299, %cst_76 [1] : vector<16x16xf32> to vector<16xf32>
    %301 = vector.shape_cast %300 : vector<16xf32> to vector<16x1xf32>
    %302 = tpu.reciprocal %301 {approx = true} : vector<16x1xf32> -> vector<16x1xf32>
    %303 = vector.broadcast %302 : vector<16x1xf32> to vector<16x16xf32>
    %304 = arith.mulf %299, %303 : vector<16x16xf32>
    %305 = arith.truncf %304 : vector<16x16xf32> to vector<16x16xbf16>
    %cst_77 = arith.constant dense<0.000000e+00> : vector<16x8xf32>
    %306 = tpu.matmul %305, %292, %cst_77 {dimension_numbers = #tpu.dot_dimension_numbers<[1], [0], [0], [1], [0, 0, 1, 1], [], []>} : vector<16x16xbf16>, vector<16x8xbf16>, vector<16x8xf32> -> vector<16x8xf32>
    %307 = vector.extract_strided_slice %246 {offsets = [0, 24], sizes = [16, 8], strides = [1, 1]} : vector<16x96xf32> to vector<16x8xf32>
    %308 = arith.truncf %307 : vector<16x8xf32> to vector<16x8xbf16>
    %309 = vector.extract_strided_slice %246 {offsets = [0, 56], sizes = [16, 8], strides = [1, 1]} : vector<16x96xf32> to vector<16x8xf32>
    %310 = arith.truncf %309 : vector<16x8xf32> to vector<16x8xbf16>
    %311 = vector.extract_strided_slice %246 {offsets = [0, 88], sizes = [16, 8], strides = [1, 1]} : vector<16x96xf32> to vector<16x8xf32>
    %312 = arith.truncf %311 : vector<16x8xf32> to vector<16x8xbf16>
    %cst_78 = arith.constant dense<0.000000e+00> : vector<16x16xf32>
    %313 = tpu.matmul %308, %310, %cst_78 {dimension_numbers = #tpu.dot_dimension_numbers<[1], [1], [0], [0], [0, 0, 1, 0], [], []>} : vector<16x8xbf16>, vector<16x8xbf16>, vector<16x16xf32> -> vector<16x16xf32>
    %314 = arith.addf %313, %37 : vector<16x16xf32>
    %cst_79 = arith.constant dense<0xFF800000> : vector<16xf32>
    %315 = vector.multi_reduction <maximumf>, %314, %cst_79 [1] : vector<16x16xf32> to vector<16xf32>
    %316 = vector.shape_cast %315 : vector<16xf32> to vector<16x1xf32>
    %317 = vector.broadcast %316 : vector<16x1xf32> to vector<16x16xf32>
    %318 = arith.subf %314, %317 : vector<16x16xf32>
    %319 = math.exp %318 : vector<16x16xf32>
    %cst_80 = arith.constant dense<0.000000e+00> : vector<16xf32>
    %320 = vector.multi_reduction <add>, %319, %cst_80 [1] : vector<16x16xf32> to vector<16xf32>
    %321 = vector.shape_cast %320 : vector<16xf32> to vector<16x1xf32>
    %322 = tpu.reciprocal %321 {approx = true} : vector<16x1xf32> -> vector<16x1xf32>
    %323 = vector.broadcast %322 : vector<16x1xf32> to vector<16x16xf32>
    %324 = arith.mulf %319, %323 : vector<16x16xf32>
    %325 = arith.truncf %324 : vector<16x16xf32> to vector<16x16xbf16>
    %cst_81 = arith.constant dense<0.000000e+00> : vector<16x8xf32>
    %326 = tpu.matmul %325, %312, %cst_81 {dimension_numbers = #tpu.dot_dimension_numbers<[1], [0], [0], [1], [0, 0, 1, 1], [], []>} : vector<16x16xbf16>, vector<16x8xbf16>, vector<16x8xf32> -> vector<16x8xf32>
    %327 = tpu.concatenate %266, %286, %306, %326 in 1 : vector<16x8xf32>, vector<16x8xf32>, vector<16x8xf32>, vector<16x8xf32> -> vector<16x32xf32>
    %328 = arith.truncf %327 : vector<16x32xf32> to vector<16x32xbf16>
    %cst_82 = arith.constant dense<0.000000e+00> : vector<16x32xf32>
    %329 = tpu.matmul %328, %220, %cst_82 {dimension_numbers = #tpu.dot_dimension_numbers<[1], [0], [0], [1], [0, 0, 1, 1], [], []>} : vector<16x32xbf16>, vector<32x32xbf16>, vector<16x32xf32> -> vector<16x32xf32>
    %330 = vector.broadcast %214 : vector<1x32xf32> to vector<16x32xf32>
    %331 = arith.addf %329, %330 : vector<16x32xf32>
    %332 = arith.addf %206, %331 : vector<16x32xf32>
    %cst_83 = arith.constant dense<0.000000e+00> : vector<16xf32>
    %333 = vector.multi_reduction <add>, %332, %cst_83 [1] : vector<16x32xf32> to vector<16xf32>
    %334 = vector.shape_cast %333 : vector<16xf32> to vector<16x1xf32>
    %cst_84 = arith.constant 3.200000e+01 : f32
    %335 = vector.broadcast %cst_84 : f32 to vector<16x1xf32>
    %336 = arith.divf %334, %335 : vector<16x1xf32>
    %337 = arith.mulf %332, %332 : vector<16x32xf32>
    %cst_85 = arith.constant dense<0.000000e+00> : vector<16xf32>
    %338 = vector.multi_reduction <add>, %337, %cst_85 [1] : vector<16x32xf32> to vector<16xf32>
    %339 = vector.shape_cast %338 : vector<16xf32> to vector<16x1xf32>
    %cst_86 = arith.constant 3.200000e+01 : f32
    %340 = vector.broadcast %cst_86 : f32 to vector<16x1xf32>
    %341 = arith.divf %339, %340 : vector<16x1xf32>
    %342 = arith.mulf %336, %336 : vector<16x1xf32>
    %343 = arith.subf %341, %342 : vector<16x1xf32>
    %344 = vector.broadcast %336 : vector<16x1xf32> to vector<16x32xf32>
    %345 = arith.subf %332, %344 : vector<16x32xf32>
    %cst_87 = arith.constant 9.99999974E-6 : f32
    %346 = vector.broadcast %cst_87 : f32 to vector<16x1xf32>
    %347 = arith.addf %343, %346 : vector<16x1xf32>
    %348 = math.rsqrt %347 : vector<16x1xf32>
    %349 = vector.broadcast %348 : vector<16x1xf32> to vector<16x32xf32>
    %350 = arith.mulf %345, %349 : vector<16x32xf32>
    %351 = vector.broadcast %211 : vector<1x32xf32> to vector<16x32xf32>
    %352 = arith.mulf %350, %351 : vector<16x32xf32>
    %353 = vector.broadcast %212 : vector<1x32xf32> to vector<16x32xf32>
    %354 = arith.addf %352, %353 : vector<16x32xf32>
    %355 = arith.truncf %354 : vector<16x32xf32> to vector<16x32xbf16>
    %c1_88 = arith.constant 1 : index
    %c0_89 = arith.constant 0 : index
    %c0_90 = arith.constant 0 : index
    %356 = vector.load %arg2[%c1_88, %c0_89, %c0_90] : memref<2x32x128xbf16, #tpu.memory_space<vmem>>, vector<1x32x128xbf16>
    %357 = vector.shape_cast %356 : vector<1x32x128xbf16> to vector<32x128xbf16>
    %cst_91 = arith.constant dense<0.000000e+00> : vector<16x128xf32>
    %358 = tpu.matmul %355, %357, %cst_91 {dimension_numbers = #tpu.dot_dimension_numbers<[1], [0], [0], [1], [0, 0, 1, 1], [], []>} : vector<16x32xbf16>, vector<32x128xbf16>, vector<16x128xf32> -> vector<16x128xf32>
    %359 = vector.broadcast %215 : vector<1x128xf32> to vector<16x128xf32>
    %360 = arith.addf %358, %359 : vector<16x128xf32>
    %cst_92 = arith.constant -1.702000e+00 : f32
    %361 = vector.broadcast %cst_92 : f32 to vector<16x128xf32>
    %362 = arith.mulf %361, %360 : vector<16x128xf32>
    %363 = math.exp %362 : vector<16x128xf32>
    %cst_93 = arith.constant 1.000000e+00 : f32
    %364 = vector.broadcast %cst_93 : f32 to vector<16x128xf32>
    %365 = arith.addf %364, %363 : vector<16x128xf32>
    %366 = tpu.reciprocal %365 {approx = true} : vector<16x128xf32> -> vector<16x128xf32>
    %367 = arith.mulf %360, %366 : vector<16x128xf32>
    %368 = arith.truncf %367 : vector<16x128xf32> to vector<16x128xbf16>
    %c1_94 = arith.constant 1 : index
    %c0_95 = arith.constant 0 : index
    %c0_96 = arith.constant 0 : index
    %369 = vector.load %arg3[%c1_94, %c0_95, %c0_96] : memref<2x128x32xbf16, #tpu.memory_space<vmem>>, vector<1x128x32xbf16>
    %370 = vector.shape_cast %369 : vector<1x128x32xbf16> to vector<128x32xbf16>
    %cst_97 = arith.constant dense<0.000000e+00> : vector<16x32xf32>
    %371 = tpu.matmul %368, %370, %cst_97 {dimension_numbers = #tpu.dot_dimension_numbers<[1], [0], [0], [1], [0, 0, 1, 1], [], []>} : vector<16x128xbf16>, vector<128x32xbf16>, vector<16x32xf32> -> vector<16x32xf32>
    %372 = arith.addf %332, %371 : vector<16x32xf32>
    %373 = vector.broadcast %216 : vector<1x32xf32> to vector<16x32xf32>
    %374 = arith.addf %372, %373 : vector<16x32xf32>
    %c0_98 = arith.constant 0 : index
    %c0_99 = arith.constant 0 : index
    %375 = vector.load %arg5[%c0_98, %c0_99] : memref<16x32xf32, #tpu.memory_space<vmem>>, vector<16x32xf32>
    tpu.vector_store %arg5[%c0_98, %c0_99], %374 {strides = array<i32>} : memref<16x32xf32, #tpu.memory_space<vmem>>, vector<16x32xf32>,
    return
  }
}

</mosaic_0001>

<bundles_post_ra>
// kernel: _forward.1
= control target key start
LH: loop header
LB: loop body
LE: loop exit
PB: predicated region body
PF: predicated region fallthrough
CT: control target
= control target key end

     0   :  { %vm73_vm0 = vcmask 261120   ;;  %v21_v8 = vlaneseq  ;;  %s2394_s23 = smov 96   ;;  %v2395_v14 = vmov 0.0   ;;  %vm2396_vm1 = vmmov 0   ;;  %s2398_s28 = smov 88   ;;  %s2950_s0 = inlined_call_operand.vmem [shape: f32[16,32], index: 0, kind: input, shape index: {}, may-alias: {0,5}]   ;;  %s2951_s4 = inlined_call_operand.vmem [shape: f32[2,4,128], index: 4, kind: input, shape index: {}]   ;;  %s2952_s1 = inlined_call_operand.vmem [shape: bf16[2,32,128], index: 1, kind: input, shape index: {}]   ;;  %s2953_s2 = inlined_call_operand.vmem [shape: bf16[2,32,128], index: 2, kind: input, shape index: {}]   ;;  %s2954_s3 = inlined_call_operand.vmem [shape: bf16[2,128,32], index: 3, kind: input, shape index: {}]   ;;  %s2955_s5 = inlined_call_operand.vmem [shape: f32[16,32], index: 5, kind: output, shape index: {}, may-alias: {0,5}]  }
   0x1   :  { %v2445_v0 = vld [vmem:[%s2950_s0] sm:$0xff]  ;;  %v2450_v1 = vld [vmem:[%s2950_s0 + $0x8] sm:$0xff]  ;;  %2042 = vmatprep.subr.bf16.mxu1 %v2395_v14  ;;  %2068 = vmatprep.subr.bf16.mxu0 %v2395_v14  ;;  %vm182_vm2 = vcmask 64512   ;;  %v2397_v58 = vmov -1e+30   ;;  %vm230_vm5 = vcmask 130048  }
   0x2   :  { %v74_v2 = vsel %vm73_vm0, %v2445_v0, 0.0  ;;  %v83_v3 = vmul.f32 %v2445_v0, %v2445_v0  ;;  %v84_v4 = vmul.f32 %v2450_v1, %v2450_v1  ;;  %v77_v6 = vsel %vm73_vm0, %v2450_v1, 0.0  ;;  %v2469_v11 = vld [vmem:[%s2951_s4] sm:$0xf]  ;;  %v2481_v13 = vld [vmem:[%s2952_s1 + $0x8] sm:$0xff]   ;;  %2046 = vmatprep.mubr.msk.bf16.mxu1 %vm2396_vm1, %v2395_v14  ;;  %2070 = vmatprep.mubr.msk.bf16.mxu0 %vm2396_vm1, %v2395_v14  ;;  %s2399_s29 = smov 120  }
   0x3   :  { %75 = vadd.xlane.f32.xlu0 %v74_v2  ;;  %v2463_v9 = vshrl.u32 %v21_v8, 7  ;;  %2043 = vmatpush3.bf16.msra.mxu1 %v2481_v13  ;;  %v2490_v15 = vld [vmem:[%s2952_s1] sm:$0xff]   ;;  %v25_v53 = vand.u32 127, %v21_v8  ;;  %s2400_s30 = smov 64   ;;  %s2401_s6 = smov 80   ;;  %vm692_vm6 = vcmask 195584  }
   0x4   :  { %v85_v5 = vsel %vm73_vm0, %v83_v3, 0.0  ;;  %v88_v7 = vsel %vm73_vm0, %v84_v4, 0.0  ;;  %2044 = vmatprep.subr.bf16.mxu1 %v2395_v14  ;;  %s2402_s7 = smov 112   ;;  %s2403_s8 = smov 72  }
   0x5   :  { %86 = vadd.xlane.f32.xlu1 %v85_v5  ;;  %v107_v10 = vsub.s32 0, %v2463_v9  ;;  %v120_v42 = vsub.s32 1, %v2463_v9  ;;  %v30_v54 = vand.u32 1, %v2463_v9  ;;  %v54_v55 = vand.u32 1, %v25_v53  ;;  %s2404_s9 = smov 104   ;;  %s2405_s10 = smov 56  }
   0x6   :  { %v23_v56 = vadd.s32 8, %v2463_v9  ;;  %s2406_s11 = smov 40   ;;  %s2407_s12 = smov 48  }
   0x7   :  { %78 = vadd.xlane.f32.xlu0 %v77_v6  ;;  %v2474_v12 = vrot.slane %v2469_v11, %v107_v10  ;;  %2045 = vmatpush3.bf16.msra.mxu1 %v2490_v15  ;;  %v2509_v44 = vrot.slane %v2469_v11, %v120_v42  ;;  %vm62_vm3 = vcmp.eq.s32.totalorder %v30_v54, %v54_v55  ;;  %s2408_s13 = smov 32   ;;  %s2409_s14 = smov 8  }
   0x8   :  { %2050 = vmatprep.subr.bf16.mxu1 %v2395_v14  ;;  %v37_v57 = vand.u32 1, %v23_v56  ;;  %v2526_v59 = vsel %vm62_vm3, 0.0, %v2397_v58  ;;  %s2410_s15 = smov 16   ;;  %s2411_s16 = smov 24  }
   0x9   :  { %89 = vadd.xlane.f32.xlu1 %v88_v7 }
   0xa   :  { %vm63_vm4 = vcmp.eq.s32.totalorder %v37_v57, %v54_v55 }
   0xb   :  { %v2529_v63 = vsel %vm63_vm4, 0.0, %v2397_v58 }
  0x1d   :  { %112 = vrot.lane.b32.xlu0 %v2474_v12, %s2394_s23 }
  0x8c   :  { %v76_v16 = vpop.xlane.xlu0 %75 }
  0x8d   :  { %v81_v17 = vmul.f32 0.03125, %v76_v16 }
  0x8e   :  { %v87_v18 = vpop.xlane.xlu1 %86 }
  0x8f   :  { %v93_v19 = vmul.f32 %v81_v17, %v81_v17  ;;  %v91_v20 = vmul.f32 0.03125, %v87_v18  ;;  %v97_v30 = vsub.f32 %v2445_v0, %v81_v17 }
  0x90   :  { %v79_v21 = vpop.xlane.xlu0 %78 }
  0x91   :  { %v95_v22 = vsub.f32 %v91_v20, %v93_v19  ;;  %v82_v23 = vmul.f32 0.03125, %v79_v21 }
  0x92   :  { %v90_v24 = vpop.xlane.xlu1 %89 }
  0x93   :  { %v99_v25 = vadd.f32 1e-05, %v95_v22  ;;  %v94_v26 = vmul.f32 %v82_v23, %v82_v23  ;;  %v92_v27 = vmul.f32 0.03125, %v90_v24  ;;  %v98_v33 = vsub.f32 %v2450_v1, %v82_v23 }
  0x94   :  { %v113_v37 = vpop.permute.xlu0 %112 }
  0x95   :  { %2298 = vrsqrt.f32 %v99_v25  ;;  %v96_v28 = vsub.f32 %v92_v27, %v94_v26 }
  0x97   :  { %v100_v29 = vadd.f32 1e-05, %v96_v28 }
  0x99   :  { %2300 = vrsqrt.f32 %v100_v29 }
  0xa2   :  { %v2299_v31 = vpop.eup %2298 }
  0xa3   :  { %v103_v32 = vmul.f32 %v2299_v31, %v97_v30 }
  0xa5   :  { %v109_v36 = vmul.f32 %v2474_v12, %v103_v32 }
  0xa6   :  { %v2301_v34 = vpop.eup %2300 }
  0xa7   :  { %v104_v35 = vmul.f32 %v2301_v34, %v98_v33  ;;  %v115_v39 = vadd.f32 %v113_v37, %v109_v36 }
  0xa9   :  { %v110_v38 = vmul.f32 %v2474_v12, %v104_v35 }
  0xab   :  { %v116_v40 = vadd.f32 %v113_v37, %v110_v38 }
  0xad   :  { %v117_v41 = vpack.c.bf16 %v116_v40, %v115_v39 }
  0xaf   :  { %2047 = vmatmul.mubr.msk.bf16.vlgmr.msra.gmra.mxu1 %vm73_vm0, %v117_v41 }
  0xb0   :  { %2052 = vmatprep.mubr.msk.bf16.mxu1 %vm2396_vm1, %v2395_v14 }
 0x16f   :  { %v171_v43 = vpop.f32.mrf.mxu1 }
 0x170   :  { %v172_v47 = vadd.f32 %v171_v43, %v2509_v44 }
 0x171   :  { %v2048_v45 = vpop.f32.mrf.mxu1 }
 0x173   :  { %v174_v46 = vpop.f32.mrf.mxu1 }
 0x174   :  { %v175_v48 = vadd.f32 %v174_v46, %v2509_v44 }
 0x175   :  { %v2049_v49 = vpop.f32.mrf.mxu1 }
 0x176   :  { %v2513_v50 = vpack.c.bf16 %v175_v48, %v172_v47 }
 0x178   :  { %180 = vrot.lane.b32.xlu1 %v2513_v50, %s2394_s23 }
 0x1ea   :  { %v181_v51 = vpop.permute.xlu1 %180 }
 0x1eb   :  { %v187_v52 = vsel %vm182_vm2, %v181_v51, 0 }
 0x1ec   :  { %2051 = vmatpush3.bf16.xpose.msra.mxu1 %v187_v52 }
 0x1ed   :  { %2056 = vmatprep.subr.bf16.mxu1 %v2395_v14 }
 0x1f3   :  { %2053 = vmatmul.mubr.msk.bf16.vlgmr.msra.gmra.mxu1 %vm182_vm2, %v2513_v50 }
 0x1f4   :  { %2058 = vmatprep.mubr.msk.bf16.mxu1 %vm2396_vm1, %v2395_v14 }
 0x2b3   :  { %v223_v60 = vpop.f32.mrf.mxu1 }
 0x2b4   :  { %v224_v61 = vadd.f32 %v223_v60, %v2526_v59 }
 0x2b5   :  { %v2054_v62 = vpop.f32.mrf.mxu1 }
 0x2b6   :  { %v231_v2 = vsel %vm230_vm5, %v224_v61, -inf }
 0x2b7   :  { %232 = vmax.xlane.f32.xlu1 %v231_v2  ;;  %v226_v3 = vpop.f32.mrf.mxu1 }
 0x2b8   :  { %v227_v4 = vadd.f32 %v226_v3, %v2529_v63 }
 0x2b9   :  { %v2055_v5 = vpop.f32.mrf.mxu1 }
 0x2ba   :  { %v234_v6 = vsel %vm230_vm5, %v227_v4, -inf }
 0x2bb   :  { %235 = vmax.xlane.f32.xlu0 %v234_v6 }
 0x2c8   :  { %303 = vrot.lane.b32.xlu1 %v2513_v50, %s2398_s28 }
 0x340   :  { %v233_v7 = vpop.xlane.xlu1 %232 }
 0x341   :  { %v237_v8 = vsub.f32 %v224_v61, %v233_v7 }
 0x343   :  { %v239_v16 = vmul.f32 1.442695, %v237_v8 }
 0x344   :  { %v236_v17 = vpop.xlane.xlu0 %235  ;;  %v304_v24 = vpop.permute.xlu1 %303 }
 0x345   :  { %2302 = vpow2.f32 %v239_v16  ;;  %v238_v18 = vsub.f32 %v227_v4, %v236_v17  ;;  %v309_v34 = vsel %vm182_vm2, %v304_v24, 0 }
 0x347   :  { %v241_v19 = vmul.f32 1.442695, %v238_v18 }
 0x349   :  { %2304 = vpow2.f32 %v241_v19 }
 0x352   :  { %v2303_v20 = vpop.eup %2302 }
 0x353   :  { %v243_v21 = vsel %vm230_vm5, %v2303_v20, 0.0 }
 0x354   :  { %244 = vadd.xlane.f32.xlu0 %v243_v21 }
 0x356   :  { %v2305_v22 = vpop.eup %2304 }
 0x357   :  { %v246_v23 = vsel %vm230_vm5, %v2305_v22, 0.0 }
 0x358   :  { %247 = vadd.xlane.f32.xlu1 %v246_v23 }
 0x369   :  { %301 = vrot.lane.b32.xlu1 %v2513_v50, %s2399_s29 }
 0x36a   :  { %254 = vrot.lane.b32.xlu0 %v2513_v50, %s2400_s30 }
 0x36d   :  { %424 = vrot.lane.b32.xlu1 %v2513_v50, %s2401_s6 }
 0x36e   :  { %422 = vrot.lane.b32.xlu0 %v2513_v50, %s2402_s7 }
 0x371   :  { %545 = vrot.lane.b32.xlu1 %v2513_v50, %s2403_s8 }
 0x372   :  { %543 = vrot.lane.b32.xlu0 %v2513_v50, %s2404_s9 }
 0x3dd   :  { %v245_v25 = vpop.xlane.xlu0 %244 }
 0x3de   :  { %2306 = vrcp.f32 %v245_v25 }
 0x3e1   :  { %v248_v26 = vpop.xlane.xlu1 %247  ;;  %v255_v27 = vpop.permute.xlu0 %254 }
 0x3e2   :  { %2308 = vrcp.f32 %v248_v26  ;;  %2057 = vmatpush3.bf16.msra.mxu1 %v255_v27 }
 0x3e3   :  { %2062 = vmatprep.subr.bf16.mxu1 %v2395_v14 }
 0x3e5   :  { %v302_v33 = vpop.permute.xlu1 %301  ;;  %v423_v38 = vpop.permute.xlu0 %422 }
 0x3e9   :  { %v425_v35 = vpop.permute.xlu1 %424  ;;  %v544_v40 = vpop.permute.xlu0 %543 }
 0x3ea   :  { %v430_v36 = vsel %vm182_vm2, %v425_v35, 0 }
 0x3eb   :  { %v2307_v28 = vpop.eup %2306 }
 0x3ec   :  { %v251_v30 = vmul.f32 %v2307_v28, %v2303_v20 }
 0x3ed   :  { %v546_v37 = vpop.permute.xlu1 %545 }
 0x3ee   :  { %v551_v39 = vsel %vm182_vm2, %v546_v37, 0 }
 0x3ef   :  { %v2309_v29 = vpop.eup %2308 }
 0x3f0   :  { %v252_v31 = vmul.f32 %v2309_v29, %v2305_v22 }
 0x3f2   :  { %v253_v32 = vpack.c.bf16 %v252_v31, %v251_v30 }
 0x3f4   :  { %2059 = vmatmul.mubr.msk.bf16.vlgmr.msra.gmra.mxu1 %vm230_vm5, %v253_v32 }
 0x3f5   :  { %2063 = vmatpush3.bf16.xpose.msra.mxu1 %v309_v34  ;;  %2064 = vmatprep.mubr.msk.bf16.mxu1 %vm2396_vm1, %v2395_v14 }
 0x3f6   :  { %2074 = vmatprep.subr.bf16.mxu1 %v2395_v14 }
 0x3fc   :  { %2065 = vmatmul.mubr.msk.bf16.vlgmr.msra.gmra.mxu1 %vm182_vm2, %v302_v33 }
 0x3fd   :  { %2075 = vmatpush3.bf16.xpose.msra.mxu1 %v430_v36  ;;  %2076 = vmatprep.mubr.msk.bf16.mxu1 %vm2396_vm1, %v2395_v14 }
 0x3fe   :  { %2086 = vmatprep.subr.bf16.mxu1 %v2395_v14 }
 0x404   :  { %2077 = vmatmul.mubr.msk.bf16.vlgmr.msra.gmra.mxu1 %vm182_vm2, %v423_v38 }
 0x405   :  { %2087 = vmatpush3.bf16.xpose.msra.mxu1 %v551_v39  ;;  %2088 = vmatprep.mubr.msk.bf16.mxu1 %vm2396_vm1, %v2395_v14 }
 0x406   :  { %2098 = vmatprep.subr.bf16.mxu1 %v2395_v14 }
 0x40c   :  { %2089 = vmatmul.mubr.msk.bf16.vlgmr.msra.gmra.mxu1 %vm182_vm2, %v544_v40 }
 0x40d   :  { %2102 = vmatprep.mubr.msk.bf16.mxu1 %vm2396_vm1, %v2395_v14 }
 0x4b4   :  { %v2569_v41 = vpop.f32.mrf.mxu1 }
 0x4b6   :  { %v2060_v43 = vpop.f32.mrf.mxu1 }
 0x4b8   :  { %v2571_v45 = vpop.f32.mrf.mxu1 }
 0x4ba   :  { %v2061_v46 = vpop.f32.mrf.mxu1 }
 0x4bc   :  { %v345_v47 = vpop.f32.mrf.mxu1 }
 0x4bd   :  { %v346_v48 = vadd.f32 %v345_v47, %v2526_v59 }
 0x4be   :  { %v2066_v49 = vpop.f32.mrf.mxu1 }
 0x4bf   :  { %v352_v51 = vsel %vm230_vm5, %v346_v48, -inf }
 0x4c0   :  { %353 = vmax.xlane.f32.xlu1 %v352_v51  ;;  %v348_v52 = vpop.f32.mrf.mxu1 }
 0x4c1   :  { %v349_v53 = vadd.f32 %v348_v52, %v2529_v63 }
 0x4c2   :  { %v2067_v54 = vpop.f32.mrf.mxu1 }
 0x4c3   :  { %v355_v55 = vsel %vm230_vm5, %v349_v53, -inf }
 0x4c4   :  { %356 = vmax.xlane.f32.xlu0 %v355_v55  ;;  %v466_v56 = vpop.f32.mrf.mxu1 }
 0x4c5   :  { %v467_v57 = vadd.f32 %v466_v56, %v2526_v59 }
 0x4c6   :  { %v2078_v58 = vpop.f32.mrf.mxu1 }
 0x4c7   :  { %v473_v60 = vsel %vm230_vm5, %v467_v57, -inf }
 0x4c8   :  { %474 = vmax.xlane.f32.xlu0 %v473_v60  ;;  %v469_v61 = vpop.f32.mrf.mxu1 }
 0x4c9   :  { %v470_v62 = vadd.f32 %v469_v61, %v2529_v63 }
 0x4ca   :  { %v2079_v2 = vpop.f32.mrf.mxu1 }
 0x4cb   :  { %v476_v3 = vsel %vm230_vm5, %v470_v62, -inf }
 0x4cc   :  { %477 = vmax.xlane.f32.xlu0 %v476_v3  ;;  %v587_v4 = vpop.f32.mrf.mxu1 }
 0x4cd   :  { %v588_v5 = vadd.f32 %v587_v4, %v2526_v59 }
 0x4ce   :  { %v2090_v6 = vpop.f32.mrf.mxu1 }
 0x4cf   :  { %v594_v7 = vsel %vm230_vm5, %v588_v5, -inf }
 0x4d0   :  { %595 = vmax.xlane.f32.xlu1 %v594_v7  ;;  %v590_v8 = vpop.f32.mrf.mxu1 }
 0x4d1   :  { %v591_v16 = vadd.f32 %v590_v8, %v2529_v63 }
 0x4d2   :  { %v2091_v17 = vpop.f32.mrf.mxu1 }
 0x4d3   :  { %v597_v18 = vsel %vm230_vm5, %v591_v16, -inf }
 0x4d4   :  { %598 = vmax.xlane.f32.xlu0 %v597_v18 }
 0x4e1   :  { %375 = vrot.lane.b32.xlu1 %v2513_v50, %s2405_s10 }
 0x549   :  { %v354_v19 = vpop.xlane.xlu1 %353 }
 0x54a   :  { %v358_v20 = vsub.f32 %v346_v48, %v354_v19 }
 0x54c   :  { %v360_v21 = vmul.f32 1.442695, %v358_v20 }
 0x54d   :  { %v357_v22 = vpop.xlane.xlu0 %356 }
 0x54e   :  { %2310 = vpow2.f32 %v360_v21  ;;  %v359_v23 = vsub.f32 %v349_v53, %v357_v22 }
 0x550   :  { %v362_v24 = vmul.f32 1.442695, %v359_v23 }
 0x551   :  { %v475_v25 = vpop.xlane.xlu0 %474 }
 0x552   :  { %2312 = vpow2.f32 %v362_v24  ;;  %v479_v26 = vsub.f32 %v467_v57, %v475_v25 }
 0x554   :  { %v481_v27 = vmul.f32 1.442695, %v479_v26 }
 0x555   :  { %v478_v28 = vpop.xlane.xlu0 %477 }
 0x556   :  { %2314 = vpow2.f32 %v481_v27  ;;  %v480_v29 = vsub.f32 %v470_v62, %v478_v28 }
 0x558   :  { %v483_v30 = vmul.f32 1.442695, %v480_v29 }
 0x559   :  { %v596_v31 = vpop.xlane.xlu1 %595 }
 0x55a   :  { %2316 = vpow2.f32 %v483_v30  ;;  %v600_v32 = vsub.f32 %v588_v5, %v596_v31 }
 0x55b   :  { %v2311_v33 = vpop.eup %2310 }
 0x55c   :  { %v602_v34 = vmul.f32 1.442695, %v600_v32  ;;  %v364_v35 = vsel %vm230_vm5, %v2311_v33, 0.0 }
 0x55d   :  { %365 = vadd.xlane.f32.xlu1 %v364_v35  ;;  %v376_v36 = vpop.permute.xlu1 %375  ;;  %v599_v37 = vpop.xlane.xlu0 %598 }
 0x55e   :  { %2318 = vpow2.f32 %v602_v34  ;;  %v601_v38 = vsub.f32 %v591_v16, %v599_v37  ;;  %2069 = vmatpush3.bf16.msra.mxu0 %v376_v36 }
 0x55f   :  { %v2313_v39 = vpop.eup %2312  ;;  %2080 = vmatprep.subr.bf16.mxu0 %v2395_v14 }
 0x560   :  { %v604_v40 = vmul.f32 1.442695, %v601_v38  ;;  %v367_v43 = vsel %vm230_vm5, %v2313_v39, 0.0 }
 0x561   :  { %368 = vadd.xlane.f32.xlu0 %v367_v43 }
 0x562   :  { %2320 = vpow2.f32 %v604_v40 }
 0x563   :  { %v2315_v46 = vpop.eup %2314 }
 0x564   :  { %v485_v47 = vsel %vm230_vm5, %v2315_v46, 0.0 }
 0x565   :  { %486 = vadd.xlane.f32.xlu1 %v485_v47 }
 0x567   :  { %v2317_v48 = vpop.eup %2316 }
 0x568   :  { %v488_v49 = vsel %vm230_vm5, %v2317_v48, 0.0 }
 0x569   :  { %489 = vadd.xlane.f32.xlu0 %v488_v49 }
 0x56b   :  { %v2319_v51 = vpop.eup %2318 }
 0x56c   :  { %v606_v52 = vsel %vm230_vm5, %v2319_v51, 0.0 }
 0x56d   :  { %607 = vadd.xlane.f32.xlu1 %v606_v52 }
 0x56f   :  { %v2321_v53 = vpop.eup %2320 }
 0x570   :  { %v609_v54 = vsel %vm230_vm5, %v2321_v53, 0.0 }
 0x571   :  { %610 = vadd.xlane.f32.xlu0 %v609_v54 }
 0x57e   :  { %617 = vrot.lane.b32.xlu1 %v2513_v50, %s2406_s11 }
 0x582   :  { %698 = vrot.lane.b32.xlu1 %v2481_v13, %s2408_s13 }
 0x587   :  { %496 = vrot.lane.b32.xlu0 %v2513_v50, %s2407_s12 }
 0x5e6   :  { %v366_v55 = vpop.xlane.xlu1 %365 }
 0x5e7   :  { %2322 = vrcp.f32 %v366_v55 }
 0x5ea   :  { %v369_v56 = vpop.xlane.xlu0 %368 }
 0x5eb   :  { %2324 = vrcp.f32 %v369_v56 }
 0x5ee   :  { %v487_v57 = vpop.xlane.xlu1 %486 }
 0x5ef   :  { %2326 = vrcp.f32 %v487_v57 }
 0x5f2   :  { %v490_v58 = vpop.xlane.xlu0 %489 }
 0x5f3   :  { %2328 = vrcp.f32 %v490_v58 }
 0x5f4   :  { %v2323_v60 = vpop.eup %2322 }
 0x5f5   :  { %v372_v2 = vmul.f32 %v2323_v60, %v2311_v33 }
 0x5f6   :  { %v608_v61 = vpop.xlane.xlu1 %607 }
 0x5f7   :  { %2330 = vrcp.f32 %v608_v61 }
 0x5f8   :  { %v2325_v62 = vpop.eup %2324 }
 0x5f9   :  { %v373_v3 = vmul.f32 %v2325_v62, %v2313_v39 }
 0x5fa   :  { %v611_v4 = vpop.xlane.xlu0 %610  ;;  %v618_v18 = vpop.permute.xlu1 %617 }
 0x5fb   :  { %2332 = vrcp.f32 %v611_v4  ;;  %v374_v5 = vpack.c.bf16 %v373_v3, %v372_v2 }
 0x5fc   :  { %v2327_v50 = vpop.eup %2326 }
 0x5fd   :  { %2071 = vmatmul.mubr.msk.bf16.vlgmr.msra.gmra.mxu0 %vm230_vm5, %v374_v5  ;;  %v493_v8 = vmul.f32 %v2327_v50, %v2315_v46 }
 0x5fe   :  { %v497_v6 = vpop.permute.xlu0 %496  ;;  %2082 = vmatprep.mubr.msk.bf16.mxu0 %vm2396_vm1, %v2395_v14  ;;  %v699_v24 = vpop.permute.xlu1 %698 }
 0x5ff   :  { %2081 = vmatpush3.bf16.msra.mxu0 %v497_v6  ;;  %2099 = vmatpush3.bf16.msra.mxu1 %v699_v24 }
 0x600   :  { %v2329_v7 = vpop.eup %2328  ;;  %2092 = vmatprep.subr.bf16.mxu0 %v2395_v14  ;;  %2100 = vmatprep.subr.bf16.mxu1 %v2395_v14 }
 0x601   :  { %v494_v16 = vmul.f32 %v2329_v7, %v2317_v48 }
 0x603   :  { %v495_v17 = vpack.c.bf16 %v494_v16, %v493_v8 }
 0x604   :  { %v2331_v19 = vpop.eup %2330 }
 0x605   :  { %2083 = vmatmul.mubr.msk.bf16.vlgmr.msra.gmra.mxu0 %vm230_vm5, %v495_v17  ;;  %v614_v21 = vmul.f32 %v2331_v19, %v2319_v51  ;;  %v2277_v17 = vld [vmem:[%s2953_s2] sm:$0xff]  }
 0x606   :  { %2093 = vmatpush3.bf16.msra.mxu0 %v618_v18  ;;  %2094 = vmatprep.mubr.msk.bf16.mxu0 %vm2396_vm1, %v2395_v14 }
 0x607   :  { %2106 = vmatprep.subr.bf16.mxu0 %v2395_v14 }
 0x608   :  { %v2333_v20 = vpop.eup %2332 }
 0x609   :  { %v615_v22 = vmul.f32 %v2333_v20, %v2321_v53 }
 0x60b   :  { %v616_v23 = vpack.c.bf16 %v615_v22, %v614_v21 }
 0x60d   :  { %2095 = vmatmul.mubr.msk.bf16.vlgmr.msra.gmra.mxu0 %vm230_vm5, %v616_v23 }
 0x60e   :  { %2110 = vmatprep.mubr.msk.bf16.mxu0 %vm2396_vm1, %v2395_v14 }
 0x6bd   :  { %v415_v25 = vpop.f32.mrf.mxu0 }
 0x6bf   :  { %v2072_v26 = vpop.f32.mrf.mxu0 }
 0x6c1   :  { %v418_v27 = vpop.f32.mrf.mxu0 }
 0x6c2   :  { %v2244_v28 = vpack.i.bf16 %v418_v27, %v415_v25 }
 0x6c3   :  { %v2073_v29 = vpop.f32.mrf.mxu0 }
 0x6c4   :  { %2245 = vrot.lane.b32.xlu1 %v2244_v28, %s2409_s14 }
 0x6c5   :  { %v536_v30 = vpop.f32.mrf.mxu0 }
 0x6c7   :  { %v2084_v31 = vpop.f32.mrf.mxu0 }
 0x6c9   :  { %v539_v32 = vpop.f32.mrf.mxu0 }
 0x6ca   :  { %v2249_v33 = vpack.i.bf16 %v539_v32, %v536_v30 }
 0x6cb   :  { %v2085_v34 = vpop.f32.mrf.mxu0 }
 0x6cc   :  { %2250 = vrot.lane.b32.xlu0 %v2249_v33, %s2410_s15 }
 0x6cd   :  { %v657_v13 = vpop.f32.mrf.mxu0 }
 0x6cf   :  { %v2096_v35 = vpop.f32.mrf.mxu0 }
 0x6d0   :  { %696 = vrot.lane.b32.xlu0 %v2490_v15, %s2408_s13 }
 0x6d1   :  { %v660_v36 = vpop.f32.mrf.mxu0 }
 0x6d2   :  { %v2254_v37 = vpack.i.bf16 %v660_v36, %v657_v13 }
 0x6d3   :  { %v2097_v38 = vpop.f32.mrf.mxu0 }
 0x6d4   :  { %2255 = vrot.lane.b32.xlu1 %v2254_v37, %s2411_s16 }
 0x6d8   :  { %703 = vrot.lane.b32.xlu1 %v2509_v44, %s2408_s13 }
 0x736   :  { %v2246_v40 = vpop.permute.xlu1 %2245 }
 0x737   :  { %v2248_v46 = vunpack.i.h.bf16 %v2246_v40  ;;  %v2247_v47 = vunpack.i.l.bf16 %v2246_v40 }
 0x739   :  { %v689_v51 = vsel %vm182_vm2, %v2571_v45, %v2248_v46  ;;  %v688_v52 = vsel %vm182_vm2, %v2569_v41, %v2247_v47  ;;  %v2278_v47 = vld [vmem:[%s2954_s3 + $0x38] sm:$0xff]  }
 0x73e   :  { %v2251_v39 = vpop.permute.xlu0 %2250 }
 0x73f   :  { %v2253_v48 = vunpack.i.h.bf16 %v2251_v39  ;;  %v2252_v49 = vunpack.i.l.bf16 %v2251_v39 }
 0x741   :  { %v691_v54 = vsel %vm230_vm5, %v689_v51, %v2253_v48  ;;  %v690_v55 = vsel %vm230_vm5, %v688_v52, %v2252_v49  ;;  %v2279_v48 = vld [vmem:[%s2954_s3 + $0x30] sm:$0xff]   ;;  %v2280_v49 = vld [vmem:[%s2954_s3 + $0x28] sm:$0xff]   ;;  %v2282_v51 = vld [vmem:[%s2954_s3 + $0x18] sm:$0xff]  }
 0x742   :  { %v697_v43 = vpop.permute.xlu0 %696  ;;  %v2283_v52 = vld [vmem:[%s2954_s3 + $0x10] sm:$0xff]  }
 0x743   :  { %2101 = vmatpush3.bf16.msra.mxu1 %v697_v43 }
 0x744   :  { %2114 = vmatprep.subr.bf16.mxu1 %v2395_v14 }
 0x746   :  { %v2256_v15 = vpop.permute.xlu1 %2255 }
 0x747   :  { %v2258_v53 = vunpack.i.h.bf16 %v2256_v15  ;;  %v2257_v44 = vunpack.i.l.bf16 %v2256_v15  ;;  %v2281_v15 = vld [vmem:[%s2954_s3 + $0x20] sm:$0xff]  }
 0x749   :  { %v694_v56 = vsel %vm692_vm6, %v691_v54, %v2258_v53  ;;  %v693_v57 = vsel %vm692_vm6, %v690_v55, %v2257_v44  ;;  %v2284_v53 = vld [vmem:[%s2954_s3 + $0x8] sm:$0xff]   ;;  %v2285_v44 = vld [vmem:[%s2954_s3] sm:$0xff]   ;;  %v799_v54 = vsub.s32 2, %v2463_v9 }
 0x74a   :  { %v695_v58 = vpack.c.bf16 %v694_v56, %v693_v57  ;;  %v704_v45 = vpop.permute.xlu1 %703 }
 0x74b   :  { %v800_v55 = vrot.slane %v2469_v11, %v799_v54 }
 0x74c   :  { %2103 = vmatmul.mubr.msk.bf16.vlgmr.msra.gmra.mxu1 %vm73_vm0, %v695_v58 }
 0x74d   :  { %2130 = vmatprep.mubr.msk.bf16.mxu1 %vm2396_vm1, %v2395_v14  ;;  %2115 = vmatpush3.bf16.msra.mxu1 %v2278_v47 }
 0x74e   :  { %2116 = vmatprep.subr.bf16.mxu1 %v2395_v14 }
 0x751   :  { %2117 = vmatpush3.bf16.msra.mxu1 %v2279_v48 }
 0x752   :  { %2118 = vmatprep.subr.bf16.mxu1 %v2395_v14 }
 0x755   :  { %2119 = vmatpush3.bf16.msra.mxu1 %v2280_v49 }
 0x756   :  { %2120 = vmatprep.subr.bf16.mxu1 %v2395_v14 }
 0x759   :  { %2121 = vmatpush3.bf16.msra.mxu1 %v2281_v15 }
 0x75a   :  { %2122 = vmatprep.subr.bf16.mxu1 %v2395_v14 }
 0x75d   :  { %2123 = vmatpush3.bf16.msra.mxu1 %v2282_v51 }
 0x75e   :  { %2124 = vmatprep.subr.bf16.mxu1 %v2395_v14 }
 0x761   :  { %2125 = vmatpush3.bf16.msra.mxu1 %v2283_v52 }
 0x762   :  { %2126 = vmatprep.subr.bf16.mxu1 %v2395_v14 }
 0x765   :  { %2127 = vmatpush3.bf16.msra.mxu1 %v2284_v53 }
 0x766   :  { %2128 = vmatprep.subr.bf16.mxu1 %v2395_v14 }
 0x769   :  { %2129 = vmatpush3.bf16.msra.mxu1 %v2285_v44 }
 0x76a   :  { %2160 = vmatprep.subr.bf16.mxu1 %v2395_v14 }
 0x80c   :  { %v743_v60 = vpop.f32.mrf.mxu1 }
 0x80d   :  { %v744_v61 = vadd.f32 %v743_v60, %v704_v45 }
 0x80e   :  { %v2104_v41 = vpop.f32.mrf.mxu1 }
 0x80f   :  { %v2632_v62 = vadd.f32 %v744_v61, %v2445_v0 }
 0x810   :  { %v746_v2 = vpop.f32.mrf.mxu1 }
 0x811   :  { %v747_v3 = vadd.f32 %v746_v2, %v704_v45  ;;  %v752_v4 = vsel %vm73_vm0, %v2632_v62, 0.0  ;;  %v760_v5 = vmul.f32 %v2632_v62, %v2632_v62 }
 0x812   :  { %753 = vadd.xlane.f32.xlu0 %v752_v4  ;;  %v2105_v50 = vpop.f32.mrf.mxu1 }
 0x813   :  { %v2639_v6 = vadd.f32 %v747_v3, %v2450_v1  ;;  %v762_v7 = vsel %vm73_vm0, %v760_v5, 0.0  ;;  %v2276_v1 = vld [vmem:[%s2953_s2 + $0x8] sm:$0xff]  }
 0x814   :  { %2107 = vmatpush3.bf16.msra.mxu0 %v2276_v1 }
 0x815   :  { %v755_v8 = vsel %vm73_vm0, %v2639_v6, 0.0  ;;  %v761_v0 = vmul.f32 %v2639_v6, %v2639_v6  ;;  %2108 = vmatprep.subr.bf16.mxu0 %v2395_v14 }
 0x816   :  { %763 = vadd.xlane.f32.xlu0 %v762_v7  ;;  %756 = vadd.xlane.f32.xlu1 %v755_v8 }
 0x817   :  { %v765_v16 = vsel %vm73_vm0, %v761_v0, 0.0 }
 0x818   :  { %2109 = vmatpush3.bf16.msra.mxu0 %v2277_v17 }
 0x819   :  { %2134 = vmatprep.subr.bf16.mxu0 %v2395_v14 }
 0x81a   :  { %766 = vadd.xlane.f32.xlu0 %v765_v16 }
 0x827   :  { %787 = vrot.lane.b32.xlu1 %v2474_v12, %s2408_s13 }
 0x830   :  { %782 = vrot.lane.b32.xlu0 %v2474_v12, %s2400_s30 }
 0x89b   :  { %v754_v18 = vpop.xlane.xlu0 %753 }
 0x89c   :  { %v758_v19 = vmul.f32 0.03125, %v754_v18 }
 0x89e   :  { %v770_v22 = vmul.f32 %v758_v19, %v758_v19  ;;  %v774_v31 = vsub.f32 %v2632_v62, %v758_v19  ;;  %v979_v19 = vsub.s32 3, %v2463_v9 }
 0x89f   :  { %v764_v20 = vpop.xlane.xlu0 %763  ;;  %v757_v21 = vpop.xlane.xlu1 %756 }
 0x8a0   :  { %v768_v12 = vmul.f32 0.03125, %v764_v20  ;;  %v759_v23 = vmul.f32 0.03125, %v757_v21  ;;  %v980_v20 = vrot.slane %v2469_v11, %v979_v19 }
 0x8a2   :  { %v772_v24 = vsub.f32 %v768_v12, %v770_v22  ;;  %v771_v27 = vmul.f32 %v759_v23, %v759_v23  ;;  %v775_v13 = vsub.f32 %v2639_v6, %v759_v23 }
 0x8a3   :  { %v767_v25 = vpop.xlane.xlu0 %766  ;;  %v788_v38 = vpop.permute.xlu1 %787 }
 0x8a4   :  { %v776_v26 = vadd.f32 1e-05, %v772_v24  ;;  %v769_v28 = vmul.f32 0.03125, %v767_v25 }
 0x8a6   :  { %2334 = vrsqrt.f32 %v776_v26  ;;  %v773_v29 = vsub.f32 %v769_v28, %v771_v27 }
 0x8a7   :  { %v783_v34 = vpop.permute.xlu0 %782 }
 0x8a8   :  { %v777_v30 = vadd.f32 1e-05, %v773_v29 }
 0x8aa   :  { %2336 = vrsqrt.f32 %v777_v30 }
 0x8b3   :  { %v2335_v32 = vpop.eup %2334 }
 0x8b4   :  { %v780_v33 = vmul.f32 %v2335_v32, %v774_v31  ;;  %v2725_v31 = vld [vmem:[%s2951_s4 + $0x4] sm:$0xf]  ;;  %v2730_v32 = vld [vmem:[%s2952_s1 + $0x18] sm:$0xff]  }
 0x8b6   :  { %v785_v37 = vmul.f32 %v783_v34, %v780_v33  ;;  %v2735_v33 = vrot.slane %v2725_v31, %v107_v10 }
 0x8b7   :  { %v2337_v35 = vpop.eup %2336 }
 0x8b8   :  { %v781_v36 = vmul.f32 %v2337_v35, %v775_v13  ;;  %v790_v40 = vadd.f32 %v788_v38, %v785_v37 }
 0x8ba   :  { %v786_v39 = vmul.f32 %v783_v34, %v781_v36  ;;  %v2744_v34 = vld [vmem:[%s2952_s1 + $0x10] sm:$0xff]  }
 0x8bc   :  { %v791_v43 = vadd.f32 %v788_v38, %v786_v39 }
 0x8be   :  { %v792_v46 = vpack.c.bf16 %v791_v43, %v790_v40 }
 0x8c0   :  { %2111 = vmatmul.mubr.msk.bf16.vlgmr.msra.gmra.mxu0 %vm73_vm0, %v792_v46 }
 0x8c1   :  { %2138 = vmatprep.mubr.msk.bf16.mxu0 %vm2396_vm1, %v2395_v14  ;;  %2135 = vmatpush3.bf16.msra.mxu0 %v2730_v32 }
 0x8c2   :  { %2136 = vmatprep.subr.bf16.mxu0 %v2395_v14 }
 0x8c5   :  { %2137 = vmatpush3.bf16.msra.mxu0 %v2744_v34 }
 0x8c6   :  { %2142 = vmatprep.subr.bf16.mxu0 %v2395_v14 }
 0x980   :  { %v850_v56 = vpop.f32.mrf.mxu0 }
 0x981   :  { %v851_v57 = vadd.f32 %v850_v56, %v800_v55 }
 0x982   :  { %v2112_v58 = vpop.f32.mrf.mxu0 }
 0x983   :  { %v857_v45 = vmul.f32 -1.702, %v851_v57 }
 0x984   :  { %v853_v60 = vpop.f32.mrf.mxu0 }
 0x985   :  { %v859_v61 = vmul.f32 1.442695, %v857_v45  ;;  %v854_v41 = vadd.f32 %v853_v60, %v800_v55 }
 0x986   :  { %v2113_v2 = vpop.f32.mrf.mxu0 }
 0x987   :  { %2338 = vpow2.f32 %v859_v61  ;;  %v858_v3 = vmul.f32 -1.702, %v854_v41 }
 0x989   :  { %v861_v4 = vmul.f32 1.442695, %v858_v3  ;;  %v2758_v3 = vrot.slane %v2725_v31, %v120_v42 }
 0x98b   :  { %2340 = vpow2.f32 %v861_v4 }
 0x994   :  { %v2339_v5 = vpop.eup %2338 }
 0x995   :  { %v863_v50 = vadd.f32 1.0, %v2339_v5 }
 0x997   :  { %2342 = vrcp.f32 %v863_v50 }
 0x998   :  { %v2341_v7 = vpop.eup %2340 }
 0x999   :  { %v864_v8 = vadd.f32 1.0, %v2341_v7 }
 0x99b   :  { %2344 = vrcp.f32 %v864_v8 }
 0x9a4   :  { %v2343_v0 = vpop.eup %2342 }
 0x9a5   :  { %v867_v1 = vmul.f32 %v2343_v0, %v851_v57 }
 0x9a8   :  { %v2345_v16 = vpop.eup %2344 }
 0x9a9   :  { %v868_v17 = vmul.f32 %v2345_v16, %v854_v41 }
 0x9ab   :  { %v869_v18 = vpack.c.bf16 %v868_v17, %v867_v1 }
 0x9ad   :  { %2131 = vmatmul.mubr.bf16.vlgmr.msra.gmra.mxu1 %v869_v18 }
 0x9ae   :  { %2162 = vmatprep.mubr.msk.bf16.mxu1 %vm2396_vm1, %v2395_v14 }
 0xa6d   :  { %v968_v21 = vpop.f32.mrf.mxu1 }
 0xa6e   :  { %v975_v22 = vadd.f32 %v968_v21, %v2632_v62 }
 0xa6f   :  { %v2132_v12 = vpop.f32.mrf.mxu1 }
 0xa70   :  { %v2707_v23 = vadd.f32 %v980_v20, %v975_v22 }
 0xa71   :  { %v971_v24 = vpop.f32.mrf.mxu1 }
 0xa72   :  { %v976_v25 = vadd.f32 %v971_v24, %v2639_v6  ;;  %v990_v26 = vsel %vm73_vm0, %v2707_v23, 0.0  ;;  %v998_v62 = vmul.f32 %v2707_v23, %v2707_v23 }
 0xa73   :  { %991 = vadd.xlane.f32.xlu1 %v990_v26  ;;  %v2133_v27 = vpop.f32.mrf.mxu1 }
 0xa74   :  { %v2712_v28 = vadd.f32 %v980_v20, %v976_v25  ;;  %v1000_v6 = vsel %vm73_vm0, %v998_v62, 0.0 }
 0xa76   :  { %v993_v29 = vsel %vm73_vm0, %v2712_v28, 0.0  ;;  %v999_v11 = vmul.f32 %v2712_v28, %v2712_v28 }
 0xa77   :  { %994 = vadd.xlane.f32.xlu0 %v993_v29 }
 0xa78   :  { %v1003_v30 = vsel %vm73_vm0, %v999_v11, 0.0 }
 0xa79   :  { %1004 = vadd.xlane.f32.xlu1 %v1003_v30 }
 0xa7b   :  { %1001 = vadd.xlane.f32.xlu0 %v1000_v6 }
 0xa91   :  { %1027 = vrot.lane.b32.xlu0 %v2735_v33, %s2394_s23 }
 0xafc   :  { %v992_v13 = vpop.xlane.xlu1 %991 }
 0xafd   :  { %v996_v10 = vmul.f32 0.03125, %v992_v13 }
 0xaff   :  { %v1008_v43 = vmul.f32 %v996_v10, %v996_v10  ;;  %v1012_v53 = vsub.f32 %v2707_v23, %v996_v10 }
 0xb00   :  { %v995_v35 = vpop.xlane.xlu0 %994 }
 0xb01   :  { %v997_v36 = vmul.f32 0.03125, %v995_v35 }
 0xb02   :  { %v1005_v37 = vpop.xlane.xlu1 %1004 }
 0xb03   :  { %v1009_v38 = vmul.f32 %v997_v36, %v997_v36  ;;  %v1007_v39 = vmul.f32 0.03125, %v1005_v37  ;;  %v1013_v51 = vsub.f32 %v2712_v28, %v997_v36 }
 0xb04   :  { %v1002_v40 = vpop.xlane.xlu0 %1001 }
 0xb05   :  { %v1011_v46 = vsub.f32 %v1007_v39, %v1009_v38  ;;  %v1006_v47 = vmul.f32 0.03125, %v1002_v40 }
 0xb07   :  { %v1015_v48 = vadd.f32 1e-05, %v1011_v46  ;;  %v1010_v49 = vsub.f32 %v1006_v47, %v1008_v43 }
 0xb08   :  { %v1028_v58 = vpop.permute.xlu0 %1027 }
 0xb09   :  { %2346 = vrsqrt.f32 %v1015_v48  ;;  %v1014_v15 = vadd.f32 1e-05, %v1010_v49 }
 0xb0b   :  { %2348 = vrsqrt.f32 %v1014_v15 }
 0xb16   :  { %v2347_v52 = vpop.eup %2346 }
 0xb17   :  { %v1019_v44 = vmul.f32 %v2347_v52, %v1013_v51 }
 0xb18   :  { %v2349_v55 = vpop.eup %2348 }
 0xb19   :  { %v1018_v56 = vmul.f32 %v2349_v55, %v1012_v53  ;;  %v1025_v57 = vmul.f32 %v2735_v33, %v1019_v44 }
 0xb1b   :  { %v1024_v45 = vmul.f32 %v2735_v33, %v1018_v56  ;;  %v1031_v61 = vadd.f32 %v1028_v58, %v1025_v57 }
 0xb1d   :  { %v1030_v60 = vadd.f32 %v1028_v58, %v1024_v45 }
 0xb1f   :  { %v1032_v41 = vpack.c.bf16 %v1031_v61, %v1030_v60 }
 0xb21   :  { %2139 = vmatmul.mubr.msk.bf16.vlgmr.msra.gmra.mxu0 %vm73_vm0, %v1032_v41 }
 0xb22   :  { %2144 = vmatprep.mubr.msk.bf16.mxu0 %vm2396_vm1, %v2395_v14 }
 0xbe1   :  { %v1086_v2 = vpop.f32.mrf.mxu0 }
 0xbe2   :  { %v1087_v50 = vadd.f32 %v1086_v2, %v2758_v3 }
 0xbe3   :  { %v2140_v4 = vpop.f32.mrf.mxu0 }
 0xbe5   :  { %v1089_v5 = vpop.f32.mrf.mxu0 }
 0xbe6   :  { %v1090_v7 = vadd.f32 %v1089_v5, %v2758_v3 }
 0xbe7   :  { %v2141_v8 = vpop.f32.mrf.mxu0 }
 0xbe8   :  { %v2762_v0 = vpack.c.bf16 %v1090_v7, %v1087_v50 }
 0xbea   :  { %1095 = vrot.lane.b32.xlu1 %v2762_v0, %s2394_s23 }
 0xc5c   :  { %v1096_v16 = vpop.permute.xlu1 %1095 }
 0xc5d   :  { %v1101_v1 = vsel %vm182_vm2, %v1096_v16, 0 }
 0xc5e   :  { %2143 = vmatpush3.bf16.xpose.msra.mxu0 %v1101_v1 }
 0xc5f   :  { %2148 = vmatprep.subr.bf16.mxu0 %v2395_v14 }
 0xc65   :  { %2145 = vmatmul.mubr.msk.bf16.vlgmr.msra.gmra.mxu0 %vm182_vm2, %v2762_v0 }
 0xc66   :  { %2150 = vmatprep.mubr.msk.bf16.mxu0 %vm2396_vm1, %v2395_v14 }
 0xd25   :  { %v1137_v42 = vpop.f32.mrf.mxu0 }
 0xd26   :  { %v1138_v17 = vadd.f32 %v1137_v42, %v2526_v59 }
 0xd27   :  { %v2146_v18 = vpop.f32.mrf.mxu0 }
 0xd28   :  { %v1144_v20 = vsel %vm230_vm5, %v1138_v17, -inf }
 0xd29   :  { %1145 = vmax.xlane.f32.xlu1 %v1144_v20  ;;  %v1140_v21 = vpop.f32.mrf.mxu0 }
 0xd2a   :  { %v1141_v22 = vadd.f32 %v1140_v21, %v2529_v63 }
 0xd2b   :  { %v2147_v12 = vpop.f32.mrf.mxu0 }
 0xd2c   :  { %v1147_v24 = vsel %vm230_vm5, %v1141_v22, -inf }
 0xd2d   :  { %1148 = vmax.xlane.f32.xlu0 %v1147_v24 }
 0xd3a   :  { %1216 = vrot.lane.b32.xlu1 %v2762_v0, %s2398_s28 }
 0xdb2   :  { %v1146_v25 = vpop.xlane.xlu1 %1145 }
 0xdb3   :  { %v1150_v26 = vsub.f32 %v1138_v17, %v1146_v25 }
 0xdb5   :  { %v1152_v27 = vmul.f32 1.442695, %v1150_v26 }
 0xdb6   :  { %v1149_v29 = vpop.xlane.xlu0 %1148  ;;  %v1217_v10 = vpop.permute.xlu1 %1216 }
 0xdb7   :  { %2350 = vpow2.f32 %v1152_v27  ;;  %v1151_v11 = vsub.f32 %v1141_v22, %v1149_v29  ;;  %v1222_v49 = vsel %vm182_vm2, %v1217_v10, 0 }
 0xdb9   :  { %v1154_v62 = vmul.f32 1.442695, %v1151_v11 }
 0xdbb   :  { %2352 = vpow2.f32 %v1154_v62 }
 0xdc4   :  { %v2351_v30 = vpop.eup %2350 }
 0xdc5   :  { %v1156_v6 = vsel %vm230_vm5, %v2351_v30, 0.0 }
 0xdc6   :  { %1157 = vadd.xlane.f32.xlu0 %v1156_v6 }
 0xdc8   :  { %v2353_v13 = vpop.eup %2352 }
 0xdc9   :  { %v1159_v35 = vsel %vm230_vm5, %v2353_v13, 0.0 }
 0xdca   :  { %1160 = vadd.xlane.f32.xlu1 %v1159_v35 }
 0xddb   :  { %1214 = vrot.lane.b32.xlu1 %v2762_v0, %s2399_s29 }
 0xddc   :  { %1167 = vrot.lane.b32.xlu0 %v2762_v0, %s2400_s30 }
 0xddf   :  { %1337 = vrot.lane.b32.xlu1 %v2762_v0, %s2401_s6 }
 0xde0   :  { %1335 = vrot.lane.b32.xlu0 %v2762_v0, %s2402_s7 }
 0xde3   :  { %1458 = vrot.lane.b32.xlu1 %v2762_v0, %s2403_s8 }
 0xde4   :  { %1456 = vrot.lane.b32.xlu0 %v2762_v0, %s2404_s9 }
 0xe4f   :  { %v1158_v36 = vpop.xlane.xlu0 %1157 }
 0xe50   :  { %2354 = vrcp.f32 %v1158_v36 }
 0xe53   :  { %v1161_v37 = vpop.xlane.xlu1 %1160  ;;  %v1168_v38 = vpop.permute.xlu0 %1167 }
 0xe54   :  { %2356 = vrcp.f32 %v1161_v37  ;;  %2149 = vmatpush3.bf16.msra.mxu0 %v1168_v38 }
 0xe55   :  { %2154 = vmatprep.subr.bf16.mxu0 %v2395_v14 }
 0xe57   :  { %v1215_v48 = vpop.permute.xlu1 %1214  ;;  %v1336_v53 = vpop.permute.xlu0 %1335 }
 0xe5b   :  { %v1338_v15 = vpop.permute.xlu1 %1337  ;;  %v1457_v55 = vpop.permute.xlu0 %1456 }
 0xe5c   :  { %v1343_v51 = vsel %vm182_vm2, %v1338_v15, 0 }
 0xe5d   :  { %v2355_v39 = vpop.eup %2354 }
 0xe5e   :  { %v1164_v43 = vmul.f32 %v2355_v39, %v2351_v30 }
 0xe5f   :  { %v1459_v52 = vpop.permute.xlu1 %1458 }
 0xe60   :  { %v1464_v44 = vsel %vm182_vm2, %v1459_v52, 0 }
 0xe61   :  { %v2357_v40 = vpop.eup %2356 }
 0xe62   :  { %v1165_v46 = vmul.f32 %v2357_v40, %v2353_v13 }
 0xe64   :  { %v1166_v47 = vpack.c.bf16 %v1165_v46, %v1164_v43 }
 0xe66   :  { %2151 = vmatmul.mubr.msk.bf16.vlgmr.msra.gmra.mxu0 %vm230_vm5, %v1166_v47 }
 0xe67   :  { %2155 = vmatpush3.bf16.xpose.msra.mxu0 %v1222_v49  ;;  %2156 = vmatprep.mubr.msk.bf16.mxu0 %vm2396_vm1, %v2395_v14 }
 0xe68   :  { %2166 = vmatprep.subr.bf16.mxu0 %v2395_v14 }
 0xe6e   :  { %2157 = vmatmul.mubr.msk.bf16.vlgmr.msra.gmra.mxu0 %vm182_vm2, %v1215_v48 }
 0xe6f   :  { %2167 = vmatpush3.bf16.xpose.msra.mxu0 %v1343_v51  ;;  %2168 = vmatprep.mubr.msk.bf16.mxu0 %vm2396_vm1, %v2395_v14 }
 0xe70   :  { %2178 = vmatprep.subr.bf16.mxu0 %v2395_v14 }
 0xe76   :  { %2169 = vmatmul.mubr.msk.bf16.vlgmr.msra.gmra.mxu0 %vm182_vm2, %v1336_v53 }
 0xe77   :  { %2179 = vmatpush3.bf16.xpose.msra.mxu0 %v1464_v44  ;;  %2180 = vmatprep.mubr.msk.bf16.mxu0 %vm2396_vm1, %v2395_v14 }
 0xe78   :  { %2190 = vmatprep.subr.bf16.mxu0 %v2395_v14 }
 0xe7e   :  { %2181 = vmatmul.mubr.msk.bf16.vlgmr.msra.gmra.mxu0 %vm182_vm2, %v1457_v55 }
 0xe7f   :  { %2194 = vmatprep.mubr.msk.bf16.mxu0 %vm2396_vm1, %v2395_v14 }
 0xf26   :  { %v2811_v56 = vpop.f32.mrf.mxu0 }
 0xf28   :  { %v2152_v57 = vpop.f32.mrf.mxu0 }
 0xf2a   :  { %v2813_v58 = vpop.f32.mrf.mxu0 }
 0xf2c   :  { %v2153_v45 = vpop.f32.mrf.mxu0 }
 0xf2e   :  { %v1258_v60 = vpop.f32.mrf.mxu0 }
 0xf2f   :  { %v1259_v61 = vadd.f32 %v1258_v60, %v2526_v59 }
 0xf30   :  { %v2158_v41 = vpop.f32.mrf.mxu0 }
 0xf31   :  { %v1265_v2 = vsel %vm230_vm5, %v1259_v61, -inf }
 0xf32   :  { %1266 = vmax.xlane.f32.xlu1 %v1265_v2  ;;  %v1261_v4 = vpop.f32.mrf.mxu0 }
 0xf33   :  { %v1262_v5 = vadd.f32 %v1261_v4, %v2529_v63 }
 0xf34   :  { %v2159_v50 = vpop.f32.mrf.mxu0 }
 0xf35   :  { %v1268_v7 = vsel %vm230_vm5, %v1262_v5, -inf }
 0xf36   :  { %1269 = vmax.xlane.f32.xlu0 %v1268_v7  ;;  %v1379_v8 = vpop.f32.mrf.mxu0 }
 0xf37   :  { %v1380_v16 = vadd.f32 %v1379_v8, %v2526_v59 }
 0xf38   :  { %v2170_v1 = vpop.f32.mrf.mxu0 }
 0xf39   :  { %v1386_v42 = vsel %vm230_vm5, %v1380_v16, -inf }
 0xf3a   :  { %1387 = vmax.xlane.f32.xlu0 %v1386_v42  ;;  %v1382_v17 = vpop.f32.mrf.mxu0 }
 0xf3b   :  { %v1383_v18 = vadd.f32 %v1382_v17, %v2529_v63 }
 0xf3c   :  { %v2171_v20 = vpop.f32.mrf.mxu0 }
 0xf3d   :  { %v1389_v21 = vsel %vm230_vm5, %v1383_v18, -inf }
 0xf3e   :  { %1390 = vmax.xlane.f32.xlu0 %v1389_v21  ;;  %v1500_v22 = vpop.f32.mrf.mxu0 }
 0xf3f   :  { %v1501_v12 = vadd.f32 %v1500_v22, %v2526_v59 }
 0xf40   :  { %v2182_v24 = vpop.f32.mrf.mxu0 }
 0xf41   :  { %v1507_v25 = vsel %vm230_vm5, %v1501_v12, -inf }
 0xf42   :  { %1508 = vmax.xlane.f32.xlu1 %v1507_v25  ;;  %v1503_v26 = vpop.f32.mrf.mxu0 }
 0xf43   :  { %v1504_v27 = vadd.f32 %v1503_v26, %v2529_v63 }
 0xf44   :  { %v2183_v29 = vpop.f32.mrf.mxu0 }
 0xf45   :  { %v1510_v11 = vsel %vm230_vm5, %v1504_v27, -inf }
 0xf46   :  { %1511 = vmax.xlane.f32.xlu0 %v1510_v11 }
 0xf53   :  { %1288 = vrot.lane.b32.xlu1 %v2762_v0, %s2405_s10 }
 0xfbb   :  { %v1267_v62 = vpop.xlane.xlu1 %1266 }
 0xfbc   :  { %v1271_v30 = vsub.f32 %v1259_v61, %v1267_v62 }
 0xfbe   :  { %v1273_v6 = vmul.f32 1.442695, %v1271_v30 }
 0xfbf   :  { %v1270_v13 = vpop.xlane.xlu0 %1269 }
 0xfc0   :  { %2358 = vpow2.f32 %v1273_v6  ;;  %v1272_v59 = vsub.f32 %v1262_v5, %v1270_v13 }
 0xfc2   :  { %v1275_v35 = vmul.f32 1.442695, %v1272_v59 }
 0xfc3   :  { %v1388_v10 = vpop.xlane.xlu0 %1387 }
 0xfc4   :  { %2360 = vpow2.f32 %v1275_v35  ;;  %v1392_v36 = vsub.f32 %v1380_v16, %v1388_v10 }
 0xfc6   :  { %v1394_v37 = vmul.f32 1.442695, %v1392_v36 }
 0xfc7   :  { %v1391_v38 = vpop.xlane.xlu0 %1390 }
 0xfc8   :  { %2362 = vpow2.f32 %v1394_v37  ;;  %v1393_v63 = vsub.f32 %v1383_v18, %v1391_v38 }
 0xfca   :  { %v1396_v39 = vmul.f32 1.442695, %v1393_v63 }
 0xfcb   :  { %v1509_v40 = vpop.xlane.xlu1 %1508 }
 0xfcc   :  { %2364 = vpow2.f32 %v1396_v39  ;;  %v1513_v43 = vsub.f32 %v1501_v12, %v1509_v40 }
 0xfcd   :  { %v2359_v46 = vpop.eup %2358 }
 0xfce   :  { %v1515_v47 = vmul.f32 1.442695, %v1513_v43  ;;  %v1277_v48 = vsel %vm230_vm5, %v2359_v46, 0.0 }
 0xfcf   :  { %1278 = vadd.xlane.f32.xlu1 %v1277_v48  ;;  %v1289_v49 = vpop.permute.xlu1 %1288  ;;  %v1512_v15 = vpop.xlane.xlu0 %1511 }
 0xfd0   :  { %2366 = vpow2.f32 %v1515_v47  ;;  %v1514_v51 = vsub.f32 %v1504_v27, %v1512_v15  ;;  %2161 = vmatpush3.bf16.msra.mxu1 %v1289_v49 }
 0xfd1   :  { %v2361_v52 = vpop.eup %2360  ;;  %2172 = vmatprep.subr.bf16.mxu1 %v2395_v14 }
 0xfd2   :  { %v1517_v53 = vmul.f32 1.442695, %v1514_v51  ;;  %v1280_v44 = vsel %vm230_vm5, %v2361_v52, 0.0 }
 0xfd3   :  { %1281 = vadd.xlane.f32.xlu0 %v1280_v44 }
 0xfd4   :  { %2368 = vpow2.f32 %v1517_v53 }
 0xfd5   :  { %v2363_v55 = vpop.eup %2362 }
 0xfd6   :  { %v1398_v57 = vsel %vm230_vm5, %v2363_v55, 0.0 }
 0xfd7   :  { %1399 = vadd.xlane.f32.xlu1 %v1398_v57 }
 0xfd9   :  { %v2365_v45 = vpop.eup %2364 }
 0xfda   :  { %v1401_v60 = vsel %vm230_vm5, %v2365_v45, 0.0 }
 0xfdb   :  { %1402 = vadd.xlane.f32.xlu0 %v1401_v60 }
 0xfdd   :  { %v2367_v61 = vpop.eup %2366 }
 0xfde   :  { %v1519_v41 = vsel %vm230_vm5, %v2367_v61, 0.0 }
 0xfdf   :  { %1520 = vadd.xlane.f32.xlu1 %v1519_v41 }
 0xfe1   :  { %v2369_v2 = vpop.eup %2368 }
 0xfe2   :  { %v1522_v4 = vsel %vm230_vm5, %v2369_v2, 0.0 }
 0xfe3   :  { %1523 = vadd.xlane.f32.xlu0 %v1522_v4 }
 0xff0   :  { %1530 = vrot.lane.b32.xlu1 %v2762_v0, %s2406_s11 }
 0xff4   :  { %1610 = vrot.lane.b32.xlu1 %v2730_v32, %s2408_s13 }
 0xff9   :  { %1409 = vrot.lane.b32.xlu0 %v2762_v0, %s2407_s12 }
0x1058   :  { %v1279_v5 = vpop.xlane.xlu1 %1278 }
0x1059   :  { %2370 = vrcp.f32 %v1279_v5 }
0x105c   :  { %v1282_v50 = vpop.xlane.xlu0 %1281 }
0x105d   :  { %2372 = vrcp.f32 %v1282_v50 }
0x1060   :  { %v1400_v7 = vpop.xlane.xlu1 %1399 }
0x1061   :  { %2374 = vrcp.f32 %v1400_v7 }
0x1064   :  { %v1403_v8 = vpop.xlane.xlu0 %1402 }
0x1065   :  { %2376 = vrcp.f32 %v1403_v8 }
0x1066   :  { %v2371_v16 = vpop.eup %2370 }
0x1067   :  { %v1285_v17 = vmul.f32 %v2371_v16, %v2359_v46 }
0x1068   :  { %v1521_v1 = vpop.xlane.xlu1 %1520 }
0x1069   :  { %2378 = vrcp.f32 %v1521_v1 }
0x106a   :  { %v2373_v42 = vpop.eup %2372 }
0x106b   :  { %v1286_v18 = vmul.f32 %v2373_v42, %v2361_v52 }
0x106c   :  { %v1524_v20 = vpop.xlane.xlu0 %1523  ;;  %v1531_v26 = vpop.permute.xlu1 %1530 }
0x106d   :  { %2380 = vrcp.f32 %v1524_v20  ;;  %v1287_v32 = vpack.c.bf16 %v1286_v18, %v1285_v17 }
0x106e   :  { %v2375_v0 = vpop.eup %2374 }
0x106f   :  { %2163 = vmatmul.mubr.msk.bf16.vlgmr.msra.gmra.mxu1 %vm230_vm5, %v1287_v32  ;;  %v1406_v12 = vmul.f32 %v2375_v0, %v2363_v55 }
0x1070   :  { %v1410_v21 = vpop.permute.xlu0 %1409  ;;  %2174 = vmatprep.mubr.msk.bf16.mxu1 %vm2396_vm1, %v2395_v14  ;;  %v1611_v6 = vpop.permute.xlu1 %1610 }
0x1071   :  { %2173 = vmatpush3.bf16.msra.mxu1 %v1410_v21  ;;  %2191 = vmatpush3.bf16.msra.mxu0 %v1611_v6 }
0x1072   :  { %v2377_v22 = vpop.eup %2376  ;;  %2184 = vmatprep.subr.bf16.mxu1 %v2395_v14  ;;  %2192 = vmatprep.subr.bf16.mxu0 %v2395_v14 }
0x1073   :  { %v1407_v24 = vmul.f32 %v2377_v22, %v2365_v45 }
0x1075   :  { %v1408_v25 = vpack.c.bf16 %v1407_v24, %v1406_v12  ;;  %v2289_v12 = vld [vmem:[%s2953_s2 + $0x10] sm:$0xff]  }
0x1076   :  { %v2379_v27 = vpop.eup %2378 }
0x1077   :  { %2175 = vmatmul.mubr.msk.bf16.vlgmr.msra.gmra.mxu1 %vm230_vm5, %v1408_v25  ;;  %v1527_v11 = vmul.f32 %v2379_v27, %v2367_v61 }
0x1078   :  { %2185 = vmatpush3.bf16.msra.mxu1 %v1531_v26  ;;  %2186 = vmatprep.mubr.msk.bf16.mxu1 %vm2396_vm1, %v2395_v14 }
0x1079   :  { %2198 = vmatprep.subr.bf16.mxu1 %v2395_v14 }
0x107a   :  { %v2381_v29 = vpop.eup %2380 }
0x107b   :  { %v1528_v62 = vmul.f32 %v2381_v29, %v2369_v2 }
0x107d   :  { %v1529_v30 = vpack.c.bf16 %v1528_v62, %v1527_v11 }
0x107f   :  { %2187 = vmatmul.mubr.msk.bf16.vlgmr.msra.gmra.mxu1 %vm230_vm5, %v1529_v30 }
0x1080   :  { %2202 = vmatprep.mubr.msk.bf16.mxu1 %vm2396_vm1, %v2395_v14 }
0x112f   :  { %v1328_v13 = vpop.f32.mrf.mxu1 }
0x1131   :  { %v2164_v59 = vpop.f32.mrf.mxu1 }
0x1133   :  { %v1331_v35 = vpop.f32.mrf.mxu1 }
0x1134   :  { %v2259_v10 = vpack.i.bf16 %v1331_v35, %v1328_v13 }
0x1135   :  { %v2165_v36 = vpop.f32.mrf.mxu1 }
0x1136   :  { %2260 = vrot.lane.b32.xlu1 %v2259_v10, %s2409_s14 }
0x1137   :  { %v1449_v37 = vpop.f32.mrf.mxu1 }
0x1139   :  { %v2176_v38 = vpop.f32.mrf.mxu1 }
0x113b   :  { %v1452_v63 = vpop.f32.mrf.mxu1 }
0x113c   :  { %v2264_v39 = vpack.i.bf16 %v1452_v63, %v1449_v37 }
0x113d   :  { %v2177_v40 = vpop.f32.mrf.mxu1 }
0x113e   :  { %2265 = vrot.lane.b32.xlu0 %v2264_v39, %s2410_s15 }
0x113f   :  { %v1570_v43 = vpop.f32.mrf.mxu1 }
0x1141   :  { %v2188_v46 = vpop.f32.mrf.mxu1 }
0x1142   :  { %1608 = vrot.lane.b32.xlu0 %v2744_v34, %s2408_s13 }
0x1143   :  { %v1573_v47 = vpop.f32.mrf.mxu1 }
0x1144   :  { %v2269_v48 = vpack.i.bf16 %v1573_v47, %v1570_v43 }
0x1145   :  { %v2189_v49 = vpop.f32.mrf.mxu1 }
0x1146   :  { %2270 = vrot.lane.b32.xlu1 %v2269_v48, %s2411_s16 }
0x114a   :  { %1615 = vrot.lane.b32.xlu1 %v2758_v3, %s2408_s13 }
0x11a8   :  { %v2261_v51 = vpop.permute.xlu1 %2260 }
0x11a9   :  { %v2263_v53 = vunpack.i.h.bf16 %v2261_v51  ;;  %v2262_v44 = vunpack.i.l.bf16 %v2261_v51 }
0x11ab   :  { %v1602_v34 = vsel %vm182_vm2, %v2813_v58, %v2263_v53  ;;  %v1601_v60 = vsel %vm182_vm2, %v2811_v56, %v2262_v44  ;;  %v2291_v53 = vld [vmem:[%s2954_s3 + $0x70] sm:$0xff]   ;;  %v2292_v44 = vld [vmem:[%s2954_s3 + $0x68] sm:$0xff]  }
0x11b0   :  { %v2266_v15 = vpop.permute.xlu0 %2265 }
0x11b1   :  { %v2268_v55 = vunpack.i.h.bf16 %v2266_v15  ;;  %v2267_v57 = vunpack.i.l.bf16 %v2266_v15 }
0x11b3   :  { %v1604_v3 = vsel %vm230_vm5, %v1602_v34, %v2268_v55  ;;  %v1603_v2 = vsel %vm230_vm5, %v1601_v60, %v2267_v57  ;;  %v2293_v55 = vld [vmem:[%s2954_s3 + $0x60] sm:$0xff]   ;;  %v2294_v57 = vld [vmem:[%s2954_s3 + $0x58] sm:$0xff]   ;;  %v2296_v34 = vld [vmem:[%s2954_s3 + $0x48] sm:$0xff]  }
0x11b4   :  { %v1609_v52 = vpop.permute.xlu0 %1608  ;;  %v2297_v60 = vld [vmem:[%s2954_s3 + $0x40] sm:$0xff]  }
0x11b5   :  { %2193 = vmatpush3.bf16.msra.mxu0 %v1609_v52  ;;  %v2290_v52 = vld [vmem:[%s2954_s3 + $0x78] sm:$0xff]  }
0x11b6   :  { %2206 = vmatprep.subr.bf16.mxu0 %v2395_v14 }
0x11b8   :  { %v2271_v45 = vpop.permute.xlu1 %2270 }
0x11b9   :  { %v2273_v61 = vunpack.i.h.bf16 %v2271_v45  ;;  %v2272_v41 = vunpack.i.l.bf16 %v2271_v45  ;;  %v2295_v45 = vld [vmem:[%s2954_s3 + $0x50] sm:$0xff]  }
0x11bb   :  { %v1606_v4 = vsel %vm692_vm6, %v1604_v3, %v2273_v61  ;;  %v1605_v5 = vsel %vm692_vm6, %v1603_v2, %v2272_v41  ;;  %v1713_v61 = vrot.slane %v2725_v31, %v799_v54 }
0x11bc   :  { %v1607_v50 = vpack.c.bf16 %v1606_v4, %v1605_v5  ;;  %v1616_v58 = vpop.permute.xlu1 %1615 }
0x11be   :  { %2195 = vmatmul.mubr.msk.bf16.vlgmr.msra.gmra.mxu0 %vm73_vm0, %v1607_v50 }
0x11bf   :  { %2222 = vmatprep.mubr.msk.bf16.mxu0 %vm2396_vm1, %v2395_v14  ;;  %2207 = vmatpush3.bf16.msra.mxu0 %v2290_v52 }
0x11c0   :  { %2208 = vmatprep.subr.bf16.mxu0 %v2395_v14 }
0x11c3   :  { %2209 = vmatpush3.bf16.msra.mxu0 %v2291_v53 }
0x11c4   :  { %2210 = vmatprep.subr.bf16.mxu0 %v2395_v14 }
0x11c7   :  { %2211 = vmatpush3.bf16.msra.mxu0 %v2292_v44 }
0x11c8   :  { %2212 = vmatprep.subr.bf16.mxu0 %v2395_v14 }
0x11cb   :  { %2213 = vmatpush3.bf16.msra.mxu0 %v2293_v55 }
0x11cc   :  { %2214 = vmatprep.subr.bf16.mxu0 %v2395_v14 }
0x11cf   :  { %2215 = vmatpush3.bf16.msra.mxu0 %v2294_v57 }
0x11d0   :  { %2216 = vmatprep.subr.bf16.mxu0 %v2395_v14 }
0x11d3   :  { %2217 = vmatpush3.bf16.msra.mxu0 %v2295_v45 }
0x11d4   :  { %2218 = vmatprep.subr.bf16.mxu0 %v2395_v14 }
0x11d7   :  { %2219 = vmatpush3.bf16.msra.mxu0 %v2296_v34 }
0x11d8   :  { %2220 = vmatprep.subr.bf16.mxu0 %v2395_v14 }
0x11db   :  { %2221 = vmatpush3.bf16.msra.mxu0 %v2297_v60 }
0x127e   :  { %v1655_v7 = vpop.f32.mrf.mxu0 }
0x127f   :  { %v1656_v8 = vadd.f32 %v1655_v7, %v1616_v58 }
0x1280   :  { %v2196_v56 = vpop.f32.mrf.mxu0 }
0x1281   :  { %v2874_v16 = vadd.f32 %v1656_v8, %v2707_v23 }
0x1282   :  { %v1658_v1 = vpop.f32.mrf.mxu0 }
0x1283   :  { %v1659_v42 = vadd.f32 %v1658_v1, %v1616_v58  ;;  %v1664_v17 = vsel %vm73_vm0, %v2874_v16, 0.0  ;;  %v1672_v18 = vmul.f32 %v2874_v16, %v2874_v16 }
0x1284   :  { %1665 = vadd.xlane.f32.xlu0 %v1664_v17  ;;  %v2197_v20 = vpop.f32.mrf.mxu0 }
0x1285   :  { %v2881_v32 = vadd.f32 %v1659_v42, %v2712_v28  ;;  %v1674_v0 = vsel %vm73_vm0, %v1672_v18, 0.0  ;;  %v2288_v28 = vld [vmem:[%s2953_s2 + $0x18] sm:$0xff]  }
0x1286   :  { %2199 = vmatpush3.bf16.msra.mxu1 %v2288_v28 }
0x1287   :  { %v1667_v21 = vsel %vm73_vm0, %v2881_v32, 0.0  ;;  %v1673_v23 = vmul.f32 %v2881_v32, %v2881_v32  ;;  %2200 = vmatprep.subr.bf16.mxu1 %v2395_v14 }
0x1288   :  { %1675 = vadd.xlane.f32.xlu0 %v1674_v0  ;;  %1668 = vadd.xlane.f32.xlu1 %v1667_v21 }
0x1289   :  { %v1677_v22 = vsel %vm73_vm0, %v1673_v23, 0.0  ;;  %v1894_v23 = vrot.slane %v2725_v31, %v979_v19 }
0x128a   :  { %2201 = vmatpush3.bf16.msra.mxu1 %v2289_v12 }
0x128c   :  { %1678 = vadd.xlane.f32.xlu0 %v1677_v22 }
0x1299   :  { %1699 = vrot.lane.b32.xlu1 %v2735_v33, %s2408_s13 }
0x12a2   :  { %1694 = vrot.lane.b32.xlu0 %v2735_v33, %s2400_s30 }
0x130d   :  { %v1666_v24 = vpop.xlane.xlu0 %1665 }
0x130e   :  { %v1670_v25 = vmul.f32 0.03125, %v1666_v24 }
0x1310   :  { %v1682_v29 = vmul.f32 %v1670_v25, %v1670_v25  ;;  %v1686_v36 = vsub.f32 %v2874_v16, %v1670_v25 }
0x1311   :  { %v1676_v26 = vpop.xlane.xlu0 %1675  ;;  %v1669_v27 = vpop.xlane.xlu1 %1668 }
0x1312   :  { %v1680_v11 = vmul.f32 0.03125, %v1676_v26  ;;  %v1671_v62 = vmul.f32 0.03125, %v1669_v27 }
0x1314   :  { %v1684_v33 = vsub.f32 %v1680_v11, %v1682_v29  ;;  %v1683_v13 = vmul.f32 %v1671_v62, %v1671_v62  ;;  %v1687_v39 = vsub.f32 %v2881_v32, %v1671_v62 }
0x1315   :  { %v1679_v30 = vpop.xlane.xlu0 %1678  ;;  %v1700_v47 = vpop.permute.xlu1 %1699 }
0x1316   :  { %v1688_v6 = vadd.f32 1e-05, %v1684_v33  ;;  %v1681_v59 = vmul.f32 0.03125, %v1679_v30 }
0x1318   :  { %2382 = vrsqrt.f32 %v1688_v6  ;;  %v1685_v35 = vsub.f32 %v1681_v59, %v1683_v13 }
0x1319   :  { %v1695_v63 = vpop.permute.xlu0 %1694 }
0x131a   :  { %v1689_v10 = vadd.f32 1e-05, %v1685_v35 }
0x131c   :  { %2384 = vrsqrt.f32 %v1689_v10 }
0x1325   :  { %v2383_v37 = vpop.eup %2382 }
0x1326   :  { %v1692_v38 = vmul.f32 %v2383_v37, %v1686_v36 }
0x1328   :  { %v1697_v46 = vmul.f32 %v1695_v63, %v1692_v38 }
0x1329   :  { %v2385_v40 = vpop.eup %2384 }
0x132a   :  { %v1693_v43 = vmul.f32 %v2385_v40, %v1687_v39  ;;  %v1702_v49 = vadd.f32 %v1700_v47, %v1697_v46 }
0x132c   :  { %v1698_v48 = vmul.f32 %v1695_v63, %v1693_v43 }
0x132e   :  { %v1703_v15 = vadd.f32 %v1700_v47, %v1698_v48 }
0x1330   :  { %v1704_v51 = vpack.c.bf16 %v1703_v15, %v1702_v49 }
0x1332   :  { %2203 = vmatmul.mubr.msk.bf16.vlgmr.msra.gmra.mxu1 %vm73_vm0, %v1704_v51 }
0x13f2   :  { %v1763_v41 = vpop.f32.mrf.mxu1 }
0x13f3   :  { %v1764_v3 = vadd.f32 %v1763_v41, %v1713_v61 }
0x13f4   :  { %v2204_v2 = vpop.f32.mrf.mxu1 }
0x13f5   :  { %v1770_v4 = vmul.f32 -1.702, %v1764_v3 }
0x13f6   :  { %v1766_v5 = vpop.f32.mrf.mxu1 }
0x13f7   :  { %v1772_v50 = vmul.f32 1.442695, %v1770_v4  ;;  %v1767_v58 = vadd.f32 %v1766_v5, %v1713_v61 }
0x13f8   :  { %v2205_v7 = vpop.f32.mrf.mxu1 }
0x13f9   :  { %2386 = vpow2.f32 %v1772_v50  ;;  %v1771_v8 = vmul.f32 -1.702, %v1767_v58 }
0x13fb   :  { %v1774_v14 = vmul.f32 1.442695, %v1771_v8 }
0x13fd   :  { %2388 = vpow2.f32 %v1774_v14 }
0x1406   :  { %v2387_v56 = vpop.eup %2386 }
0x1407   :  { %v1776_v1 = vadd.f32 1.0, %v2387_v56 }
0x1409   :  { %2390 = vrcp.f32 %v1776_v1 }
0x140a   :  { %v2389_v42 = vpop.eup %2388 }
0x140b   :  { %v1777_v17 = vadd.f32 1.0, %v2389_v42 }
0x140d   :  { %2392 = vrcp.f32 %v1777_v17 }
0x1416   :  { %v2391_v18 = vpop.eup %2390 }
0x1417   :  { %v1780_v20 = vmul.f32 %v2391_v18, %v1764_v3 }
0x141a   :  { %v2393_v54 = vpop.eup %2392 }
0x141b   :  { %v1781_v0 = vmul.f32 %v2393_v54, %v1767_v58 }
0x141d   :  { %v1782_v21 = vpack.c.bf16 %v1781_v0, %v1780_v20 }
0x141f   :  { %2223 = vmatmul.mubr.bf16.vlgmr.msra.gmra.mxu0 %v1782_v21 }
0x14df   :  { %v1882_v22 = vpop.f32.mrf.mxu0 }
0x14e0   :  { %v1889_v28 = vadd.f32 %v1882_v22, %v2874_v16 }
0x14e1   :  { %v2224_v12 = vpop.f32.mrf.mxu0 }
0x14e2   :  { %v1895_v24 = vadd.f32 %v1894_v23, %v1889_v28 }
0x14e3   :  { %v1885_v25 = vpop.f32.mrf.mxu0 }
0x14e4   :  { %1897 = vst.msk [vmem:[%s2955_s5] sm:$0xff] %vm73_vm0, %v1895_v24  ;;  %v1890_v26 = vadd.f32 %v1885_v25, %v2881_v32 }
0x14e5   :  { %v2225_v27 = vpop.f32.mrf.mxu0 }
0x14e6   :  { %v1896_v29 = vadd.f32 %v1894_v23, %v1890_v26 }
0x14e8   :  { %1898 = vst.msk [vmem:[%s2955_s5 + $0x8] sm:$0xff] %vm73_vm0, %v1896_v29 }

</bundles_post_ra>
